<compile_context>
chip_gen: v7x
topology: tpu7x:2x2x1
jax: 0.10.0
libtpu: 0.0.40
codegen_flags: <defaults>
</compile_context>

<pallas_src>
import math

import jax
import jax.numpy as jnp
from jax import lax
from jax.experimental import pallas as pl
from jax.experimental.pallas import tpu as pltpu

# ---------------- config (small, consistent with the module's forward) ------
VOCAB = 100
TYPE_VOCAB = 2
B = 2          # batch
S = 8          # sequence length
H = 32         # hid_dim (stand-in for 768)
NH = 4         # attention heads
DH = H // NH   # head dim
FF = 64        # FFN intermediate
NLAYERS = 2
EPS = 1e-12


# ---------------- in-kernel helpers -----------------------------------------
def _ln(x, g, b):
    mean = jnp.mean(x, axis=-1, keepdims=True)
    var = jnp.mean(jnp.square(x - mean), axis=-1, keepdims=True)
    return (x - mean) * lax.rsqrt(var + EPS) * g + b


def _gelu(x):
    # TODO(synk): BERT uses erf GELU; tanh approximation kept for robust
    # Mosaic lowering (EUP tanh).
    c = math.sqrt(2.0 / math.pi)
    return 0.5 * x * (1.0 + jnp.tanh(c * (x + 0.044715 * x * x * x)))


# ---------------- fused per-batch-element forward kernel --------------------
def fused_forward_kernel(
    emb_ref, bias_ref,
    emb_g_ref, emb_b_ref,
    wq_ref, bq_ref, wk_ref, bk_ref, wv_ref, bv_ref,
    wo_ref, bo_ref, ln1_g_ref, ln1_b_ref,
    w1_ref, b1_ref, w2_ref, b2_ref,
    ln2_g_ref, ln2_b_ref,
    head_w_ref, head_b_ref,
    score_ref,
):
    # One batch element per grid step: activations are always (S, H).
    x = _ln(emb_ref[0], emb_g_ref[...], emb_b_ref[...])          # (S, H) f32
    bias = bias_ref[...]                                          # (1, 1, S)
    scale = 1.0 / math.sqrt(DH)

    for l in range(NLAYERS):                                      # static unroll
        # ---- head-major QKV projections (leading-batch einsums, bf16 MXU) --
        xb = x.astype(jnp.bfloat16)                                # (S, H)
        xhb = jnp.broadcast_to(xb, (NH, S, H))                     # (NH, S, H)
        q = (jnp.einsum("hsd,hdk->hsk", xhb, wq_ref[l],
                        preferred_element_type=jnp.float32)
             + bq_ref[l]).astype(jnp.bfloat16)                     # (NH, S, DH)
        k = (jnp.einsum("hsd,hdk->hsk", xhb, wk_ref[l],
                        preferred_element_type=jnp.float32)
             + bk_ref[l]).astype(jnp.bfloat16)
        v = (jnp.einsum("hsd,hdk->hsk", xhb, wv_ref[l],
                        preferred_element_type=jnp.float32)
             + bv_ref[l]).astype(jnp.bfloat16)

        # ---- attention: batched over heads, contraction on last axis -------
        s = (jnp.einsum("hqd,hkd->hqk", q, k,
                        preferred_element_type=jnp.float32) * scale + bias)
        s = s - jnp.max(s, axis=-1, keepdims=True)
        p = jnp.exp(s)
        p = p * pl.reciprocal(jnp.sum(p, axis=-1, keepdims=True), approx=True)
        ctx = jnp.einsum("hqk,hkd->hqd", p.astype(jnp.bfloat16), v,
                         preferred_element_type=jnp.float32)       # (NH, S, DH)

        # ---- output projection folded per-head (no head-concat relayout) ---
        attn = jnp.einsum("hsd,hdo->hso", ctx.astype(jnp.bfloat16), wo_ref[l],
                          preferred_element_type=jnp.float32)      # (NH, S, H)
        attn_out = jnp.sum(attn, axis=0) + bo_ref[l]               # (S, H)
        x = _ln(x + attn_out, ln1_g_ref[l], ln1_b_ref[l])

        # ---- GELU FFN + residual + LayerNorm --------------------------------
        hdn = _gelu(jnp.dot(x.astype(jnp.bfloat16), w1_ref[l],
                            preferred_element_type=jnp.float32) + b1_ref[l])
        ffn = jnp.dot(hdn.astype(jnp.bfloat16), w2_ref[l],
                      preferred_element_type=jnp.float32) + b2_ref[l]
        x = _ln(x + ffn, ln2_g_ref[l], ln2_b_ref[l])

    # ---- CLS token + Linear(H, 1) head as a VPU multiply-reduce -------------
    cls = x[0:1, :]                                                # (1, H)
    score = (jnp.sum(cls * head_w_ref[...], axis=-1, keepdims=True)
             + head_b_ref[...])                                    # (1, 1)
    score_ref[...] = score.reshape(1, 1, 1)


# ---------------- model -------------------------------------------------------
@jax.jit
def rouge_kl_model(params, input_ids, attn_masks, token_ids=None):
    if token_ids is None:
        token_ids = jnp.zeros_like(input_ids)

    # Embedding gather stays in plain JAX (data-dependent gather = glue).
    emb = (params["word_emb"][input_ids]
           + params["pos_emb"][None, :, :]
           + params["type_emb"][token_ids]).astype(jnp.float32)         # (B,S,H)
    # Precomputed additive attention bias (review item).
    bias = (1.0 - attn_masks.astype(jnp.float32)).reshape(B, 1, S) * -1e9

    def batch_spec(shape):
        nd = len(shape)
        return pl.BlockSpec((1,) + tuple(shape[1:]),
                            lambda b, _n=nd: (b,) + (0,) * (_n - 1))

    def resident_spec(arr):
        nd = arr.ndim
        return pl.BlockSpec(arr.shape, lambda b, _n=nd: (0,) * _n)

    weights = (params["emb_ln_g"], params["emb_ln_b"],
               params["wq"], params["bq"], params["wk"], params["bk"],
               params["wv"], params["bv"],
               params["wo"], params["bo"], params["ln1_g"], params["ln1_b"],
               params["w1"], params["b1"], params["w2"], params["b2"],
               params["ln2_g"], params["ln2_b"],
               params["head_w"], params["head_b"])

    in_specs = ([batch_spec(emb.shape), batch_spec(bias.shape)]
                + [resident_spec(w) for w in weights])

    score = pl.pallas_call(
        fused_forward_kernel,
        out_shape=jax.ShapeDtypeStruct((B, 1, 1), jnp.float32),
        grid_spec=pltpu.PrefetchScalarGridSpec(
            num_scalar_prefetch=0,
            grid=(B,),
            in_specs=in_specs,
            out_specs=pl.BlockSpec((1, 1, 1), lambda b: (b, 0, 0)),
        ),
        compiler_params=pltpu.CompilerParams(
            dimension_semantics=("parallel",)),
    )(emb, bias, *weights)

    return score[:, 0, 0]                                   # == .squeeze(1)


# ---------------- deterministic parameter init --------------------------------
def init_params(key):
    ks = jax.random.split(key, 10)

    def nrm(k, shape, dtype=jnp.float32):
        return (jax.random.normal(k, shape, jnp.float32) * 0.02).astype(dtype)

    bf = jnp.bfloat16
    return {
        "word_emb": nrm(ks[0], (VOCAB, H)),
        "pos_emb": nrm(ks[1], (S, H)),          # sized exactly (S, H)
        "type_emb": nrm(ks[2], (TYPE_VOCAB, H)),
        "emb_ln_g": jnp.ones((1, H), jnp.float32),
        "emb_ln_b": jnp.zeros((1, H), jnp.float32),
        # per-layer, head-major weights stacked along leading NLAYERS axis
        "wq": nrm(ks[3], (NLAYERS, NH, H, DH), bf),
        "bq": jnp.zeros((NLAYERS, NH, 1, DH), jnp.float32),
        "wk": nrm(ks[4], (NLAYERS, NH, H, DH), bf),
        "bk": jnp.zeros((NLAYERS, NH, 1, DH), jnp.float32),
        "wv": nrm(ks[5], (NLAYERS, NH, H, DH), bf),
        "bv": jnp.zeros((NLAYERS, NH, 1, DH), jnp.float32),
        "wo": nrm(ks[6], (NLAYERS, NH, DH, H), bf),
        "bo": jnp.zeros((NLAYERS, 1, H), jnp.float32),
        "ln1_g": jnp.ones((NLAYERS, 1, H), jnp.float32),
        "ln1_b": jnp.zeros((NLAYERS, 1, H), jnp.float32),
        "w1": nrm(ks[7], (NLAYERS, H, FF), bf),
        "b1": jnp.zeros((NLAYERS, 1, FF), jnp.float32),
        "w2": nrm(ks[8], (NLAYERS, FF, H), bf),
        "b2": jnp.zeros((NLAYERS, 1, H), jnp.float32),
        "ln2_g": jnp.ones((NLAYERS, 1, H), jnp.float32),
        "ln2_b": jnp.zeros((NLAYERS, 1, H), jnp.float32),
        # head: torch stores W as (out, in)=(1, H); we keep (1, H) and do a
        # VPU multiply-reduce, so real checkpoint weights load without transpose.
        "head_w": nrm(ks[9], (1, H)),
        "head_b": jnp.zeros((1, 1), jnp.float32),
    }


# ---------------- main ---------------------------------------------------------
if __name__ == "__main__":
    key = jax.random.PRNGKey(0)
    pkey, ikey = jax.random.split(key)
    params = init_params(pkey)

    input_ids = jax.random.randint(ikey, (B, S), 0, VOCAB, dtype=jnp.int32)
    attn_masks = jnp.ones((B, S), jnp.int32).at[1, 6:].set(0)   # pad last 2 of row 1
    token_ids = jnp.concatenate(
        [jnp.zeros((B, S // 2), jnp.int32), jnp.ones((B, S // 2), jnp.int32)], axis=1)

    score = jax.block_until_ready(
        rouge_kl_model(params, input_ids, attn_masks, token_ids))
    assert score.shape == (B,) and score.dtype == jnp.float32
    assert bool(jnp.all(jnp.isfinite(score)))

    # token_ids=None branch also exercised
    score2 = jax.block_until_ready(rouge_kl_model(params, input_ids, attn_masks))
    assert score2.shape == (B,)
    assert bool(jnp.all(jnp.isfinite(score2)))

    print("KERNEL_OK")
</pallas_src>

<mosaic_0001>
module attributes {stable_mosaic.version = 11 : i64} {
  func.func @fused_forward_kernel(%arg0: i32, %arg1: memref<1x8x32xf32, #tpu.memory_space<vmem>>, %arg2: memref<1x1x8xf32, #tpu.memory_space<vmem>>, %arg3: memref<1x32xf32, #tpu.memory_space<vmem>>, %arg4: memref<1x32xf32, #tpu.memory_space<vmem>>, %arg5: memref<2x4x32x8xbf16, #tpu.memory_space<vmem>>, %arg6: memref<2x4x1x8xf32, #tpu.memory_space<vmem>>, %arg7: memref<2x4x32x8xbf16, #tpu.memory_space<vmem>>, %arg8: memref<2x4x1x8xf32, #tpu.memory_space<vmem>>, %arg9: memref<2x4x32x8xbf16, #tpu.memory_space<vmem>>, %arg10: memref<2x4x1x8xf32, #tpu.memory_space<vmem>>, %arg11: memref<2x4x8x32xbf16, #tpu.memory_space<vmem>>, %arg12: memref<2x1x32xf32, #tpu.memory_space<vmem>>, %arg13: memref<2x1x32xf32, #tpu.memory_space<vmem>>, %arg14: memref<2x1x32xf32, #tpu.memory_space<vmem>>, %arg15: memref<2x32x64xbf16, #tpu.memory_space<vmem>>, %arg16: memref<2x1x64xf32, #tpu.memory_space<vmem>>, %arg17: memref<2x64x32xbf16, #tpu.memory_space<vmem>>, %arg18: memref<2x1x32xf32, #tpu.memory_space<vmem>>, %arg19: memref<2x1x32xf32, #tpu.memory_space<vmem>>, %arg20: memref<2x1x32xf32, #tpu.memory_space<vmem>>, %arg21: memref<1x32xf32, #tpu.memory_space<vmem>>, %arg22: memref<1x1xf32, #tpu.memory_space<vmem>>, %arg23: memref<1x1x1xf32, #tpu.memory_space<vmem>>) attributes {dimension_semantics = [#tpu.dimension_semantics<parallel>], iteration_bounds = array<i64: 2>, scalar_prefetch = 0 : i64, scratch_operands = 0 : i64, tpu.core_type = #tpu.core_type<tc>, window_params = [{transform_indices = @transform_0, window_bounds = array<i64: 1, 8, 32>}, {transform_indices = @transform_1, window_bounds = array<i64: 1, 1, 8>}, {pipeline_mode = #tpu.pipeline_mode<synchronous>, transform_indices = @transform_2, window_bounds = array<i64: 1, 32>}, {pipeline_mode = #tpu.pipeline_mode<synchronous>, transform_indices = @transform_3, window_bounds = array<i64: 1, 32>}, {pipeline_mode = #tpu.pipeline_mode<synchronous>, transform_indices = @transform_4, window_bounds = array<i64: 2, 4, 32, 8>}, {pipeline_mode = #tpu.pipeline_mode<synchronous>, transform_indices = @transform_5, window_bounds = array<i64: 2, 4, 1, 8>}, {pipeline_mode = #tpu.pipeline_mode<synchronous>, transform_indices = @transform_6, window_bounds = array<i64: 2, 4, 32, 8>}, {pipeline_mode = #tpu.pipeline_mode<synchronous>, transform_indices = @transform_7, window_bounds = array<i64: 2, 4, 1, 8>}, {pipeline_mode = #tpu.pipeline_mode<synchronous>, transform_indices = @transform_8, window_bounds = array<i64: 2, 4, 32, 8>}, {pipeline_mode = #tpu.pipeline_mode<synchronous>, transform_indices = @transform_9, window_bounds = array<i64: 2, 4, 1, 8>}, {pipeline_mode = #tpu.pipeline_mode<synchronous>, transform_indices = @transform_10, window_bounds = array<i64: 2, 4, 8, 32>}, {pipeline_mode = #tpu.pipeline_mode<synchronous>, transform_indices = @transform_11, window_bounds = array<i64: 2, 1, 32>}, {pipeline_mode = #tpu.pipeline_mode<synchronous>, transform_indices = @transform_12, window_bounds = array<i64: 2, 1, 32>}, {pipeline_mode = #tpu.pipeline_mode<synchronous>, transform_indices = @transform_13, window_bounds = array<i64: 2, 1, 32>}, {pipeline_mode = #tpu.pipeline_mode<synchronous>, transform_indices = @transform_14, window_bounds = array<i64: 2, 32, 64>}, {pipeline_mode = #tpu.pipeline_mode<synchronous>, transform_indices = @transform_15, window_bounds = array<i64: 2, 1, 64>}, {pipeline_mode = #tpu.pipeline_mode<synchronous>, transform_indices = @transform_16, window_bounds = array<i64: 2, 64, 32>}, {pipeline_mode = #tpu.pipeline_mode<synchronous>, transform_indices = @transform_17, window_bounds = array<i64: 2, 1, 32>}, {pipeline_mode = #tpu.pipeline_mode<synchronous>, transform_indices = @transform_18, window_bounds = array<i64: 2, 1, 32>}, {pipeline_mode = #tpu.pipeline_mode<synchronous>, transform_indices = @transform_19, window_bounds = array<i64: 2, 1, 32>}, {pipeline_mode = #tpu.pipeline_mode<synchronous>, transform_indices = @transform_20, window_bounds = array<i64: 1, 32>}, {pipeline_mode = #tpu.pipeline_mode<synchronous>, transform_indices = @transform_21, window_bounds = array<i64: 1, 1>}, {transform_indices = @transform_22, window_bounds = array<i64: 1, 1, 1>}]} {
    %c0 = arith.constant 0 : index
    %c0_0 = arith.constant 0 : index
    %c0_1 = arith.constant 0 : index
    %0 = vector.load %arg1[%c0, %c0_0, %c0_1] : memref<1x8x32xf32, #tpu.memory_space<vmem>>, vector<1x8x32xf32>
    %1 = vector.shape_cast %0 : vector<1x8x32xf32> to vector<8x32xf32>
    %c0_2 = arith.constant 0 : index
    %c0_3 = arith.constant 0 : index
    %2 = vector.load %arg3[%c0_2, %c0_3] : memref<1x32xf32, #tpu.memory_space<vmem>>, vector<1x32xf32>
    %c0_4 = arith.constant 0 : index
    %c0_5 = arith.constant 0 : index
    %3 = vector.load %arg4[%c0_4, %c0_5] : memref<1x32xf32, #tpu.memory_space<vmem>>, vector<1x32xf32>
    %cst = arith.constant dense<0.000000e+00> : vector<8xf32>
    %4 = vector.multi_reduction <add>, %1, %cst [1] : vector<8x32xf32> to vector<8xf32>
    %5 = vector.shape_cast %4 : vector<8xf32> to vector<8x1xf32>
    %cst_6 = arith.constant 3.200000e+01 : f32
    %6 = vector.broadcast %cst_6 : f32 to vector<8x1xf32>
    %7 = arith.divf %5, %6 : vector<8x1xf32>
    %8 = vector.broadcast %7 : vector<8x1xf32> to vector<8x32xf32>
    %9 = arith.subf %1, %8 : vector<8x32xf32>
    %10 = arith.mulf %9, %9 : vector<8x32xf32>
    %cst_7 = arith.constant dense<0.000000e+00> : vector<8xf32>
    %11 = vector.multi_reduction <add>, %10, %cst_7 [1] : vector<8x32xf32> to vector<8xf32>
    %12 = vector.shape_cast %11 : vector<8xf32> to vector<8x1xf32>
    %cst_8 = arith.constant 3.200000e+01 : f32
    %13 = vector.broadcast %cst_8 : f32 to vector<8x1xf32>
    %14 = arith.divf %12, %13 : vector<8x1xf32>
    %15 = vector.broadcast %7 : vector<8x1xf32> to vector<8x32xf32>
    %16 = arith.subf %1, %15 : vector<8x32xf32>
    %cst_9 = arith.constant 9.99999996E-13 : f32
    %17 = vector.broadcast %cst_9 : f32 to vector<8x1xf32>
    %18 = arith.addf %14, %17 : vector<8x1xf32>
    %19 = math.rsqrt %18 : vector<8x1xf32>
    %20 = vector.broadcast %19 : vector<8x1xf32> to vector<8x32xf32>
    %21 = arith.mulf %16, %20 : vector<8x32xf32>
    %22 = vector.broadcast %2 : vector<1x32xf32> to vector<8x32xf32>
    %23 = arith.mulf %21, %22 : vector<8x32xf32>
    %24 = vector.broadcast %3 : vector<1x32xf32> to vector<8x32xf32>
    %25 = arith.addf %23, %24 : vector<8x32xf32>
    %c0_10 = arith.constant 0 : index
    %c0_11 = arith.constant 0 : index
    %c0_12 = arith.constant 0 : index
    %26 = vector.load %arg2[%c0_10, %c0_11, %c0_12] : memref<1x1x8xf32, #tpu.memory_space<vmem>>, vector<1x1x8xf32>
    %27 = arith.truncf %25 : vector<8x32xf32> to vector<8x32xbf16>
    %28 = vector.shape_cast %27 : vector<8x32xbf16> to vector<1x8x32xbf16>
    %29 = vector.broadcast %28 : vector<1x8x32xbf16> to vector<4x8x32xbf16>
    %c0_13 = arith.constant 0 : index
    %c0_14 = arith.constant 0 : index
    %c0_15 = arith.constant 0 : index
    %c0_16 = arith.constant 0 : index
    %30 = vector.load %arg5[%c0_13, %c0_14, %c0_15, %c0_16] : memref<2x4x32x8xbf16, #tpu.memory_space<vmem>>, vector<1x4x32x8xbf16>
    %31 = vector.shape_cast %30 : vector<1x4x32x8xbf16> to vector<4x32x8xbf16>
    "tpu.trace_start"() <{level = 10 : i32, message = "hsd,hdk->hsk"}> : () -> ()
    %cst_17 = arith.constant dense<0.000000e+00> : vector<4x8x8xf32>
    %32 = tpu.matmul %29, %31, %cst_17 {dimension_numbers = #tpu.dot_dimension_numbers<[2], [1], [1], [2], [0, 0, 0, 1, 1, 2], [0], [0]>} : vector<4x8x32xbf16>, vector<4x32x8xbf16>, vector<4x8x8xf32> -> vector<4x8x8xf32>
    "tpu.trace_stop"() : () -> ()
    %c0_18 = arith.constant 0 : index
    %c0_19 = arith.constant 0 : index
    %c0_20 = arith.constant 0 : index
    %c0_21 = arith.constant 0 : index
    %33 = vector.load %arg6[%c0_18, %c0_19, %c0_20, %c0_21] : memref<2x4x1x8xf32, #tpu.memory_space<vmem>>, vector<1x4x1x8xf32>
    %34 = vector.shape_cast %33 : vector<1x4x1x8xf32> to vector<4x1x8xf32>
    %35 = vector.broadcast %34 : vector<4x1x8xf32> to vector<4x8x8xf32>
    %36 = arith.addf %32, %35 : vector<4x8x8xf32>
    %37 = arith.truncf %36 : vector<4x8x8xf32> to vector<4x8x8xbf16>
    %c0_22 = arith.constant 0 : index
    %c0_23 = arith.constant 0 : index
    %c0_24 = arith.constant 0 : index
    %c0_25 = arith.constant 0 : index
    %38 = vector.load %arg7[%c0_22, %c0_23, %c0_24, %c0_25] : memref<2x4x32x8xbf16, #tpu.memory_space<vmem>>, vector<1x4x32x8xbf16>
    %39 = vector.shape_cast %38 : vector<1x4x32x8xbf16> to vector<4x32x8xbf16>
    "tpu.trace_start"() <{level = 10 : i32, message = "hsd,hdk->hsk"}> : () -> ()
    %cst_26 = arith.constant dense<0.000000e+00> : vector<4x8x8xf32>
    %40 = tpu.matmul %29, %39, %cst_26 {dimension_numbers = #tpu.dot_dimension_numbers<[2], [1], [1], [2], [0, 0, 0, 1, 1, 2], [0], [0]>} : vector<4x8x32xbf16>, vector<4x32x8xbf16>, vector<4x8x8xf32> -> vector<4x8x8xf32>
    "tpu.trace_stop"() : () -> ()
    %c0_27 = arith.constant 0 : index
    %c0_28 = arith.constant 0 : index
    %c0_29 = arith.constant 0 : index
    %c0_30 = arith.constant 0 : index
    %41 = vector.load %arg8[%c0_27, %c0_28, %c0_29, %c0_30] : memref<2x4x1x8xf32, #tpu.memory_space<vmem>>, vector<1x4x1x8xf32>
    %42 = vector.shape_cast %41 : vector<1x4x1x8xf32> to vector<4x1x8xf32>
    %43 = vector.broadcast %42 : vector<4x1x8xf32> to vector<4x8x8xf32>
    %44 = arith.addf %40, %43 : vector<4x8x8xf32>
    %45 = arith.truncf %44 : vector<4x8x8xf32> to vector<4x8x8xbf16>
    %c0_31 = arith.constant 0 : index
    %c0_32 = arith.constant 0 : index
    %c0_33 = arith.constant 0 : index
    %c0_34 = arith.constant 0 : index
    %46 = vector.load %arg9[%c0_31, %c0_32, %c0_33, %c0_34] : memref<2x4x32x8xbf16, #tpu.memory_space<vmem>>, vector<1x4x32x8xbf16>
    %47 = vector.shape_cast %46 : vector<1x4x32x8xbf16> to vector<4x32x8xbf16>
    "tpu.trace_start"() <{level = 10 : i32, message = "hsd,hdk->hsk"}> : () -> ()
    %cst_35 = arith.constant dense<0.000000e+00> : vector<4x8x8xf32>
    %48 = tpu.matmul %29, %47, %cst_35 {dimension_numbers = #tpu.dot_dimension_numbers<[2], [1], [1], [2], [0, 0, 0, 1, 1, 2], [0], [0]>} : vector<4x8x32xbf16>, vector<4x32x8xbf16>, vector<4x8x8xf32> -> vector<4x8x8xf32>
    "tpu.trace_stop"() : () -> ()
    %c0_36 = arith.constant 0 : index
    %c0_37 = arith.constant 0 : index
    %c0_38 = arith.constant 0 : index
    %c0_39 = arith.constant 0 : index
    %49 = vector.load %arg10[%c0_36, %c0_37, %c0_38, %c0_39] : memref<2x4x1x8xf32, #tpu.memory_space<vmem>>, vector<1x4x1x8xf32>
    %50 = vector.shape_cast %49 : vector<1x4x1x8xf32> to vector<4x1x8xf32>
    %51 = vector.broadcast %50 : vector<4x1x8xf32> to vector<4x8x8xf32>
    %52 = arith.addf %48, %51 : vector<4x8x8xf32>
    %53 = arith.truncf %52 : vector<4x8x8xf32> to vector<4x8x8xbf16>
    "tpu.trace_start"() <{level = 10 : i32, message = "hqd,hkd->hqk"}> : () -> ()
    %cst_40 = arith.constant dense<0.000000e+00> : vector<4x8x8xf32>
    %54 = tpu.matmul %37, %45, %cst_40 {dimension_numbers = #tpu.dot_dimension_numbers<[2], [2], [1], [1], [0, 0, 0, 1, 1, 1], [0], [0]>} : vector<4x8x8xbf16>, vector<4x8x8xbf16>, vector<4x8x8xf32> -> vector<4x8x8xf32>
    "tpu.trace_stop"() : () -> ()
    %cst_41 = arith.constant 0.353553385 : f32
    %55 = vector.broadcast %cst_41 : f32 to vector<4x8x8xf32>
    %56 = arith.mulf %54, %55 : vector<4x8x8xf32>
    %57 = vector.broadcast %26 : vector<1x1x8xf32> to vector<4x8x8xf32>
    %58 = arith.addf %56, %57 : vector<4x8x8xf32>
    %cst_42 = arith.constant dense<0xFF800000> : vector<4x8xf32>
    %59 = vector.multi_reduction <maximumf>, %58, %cst_42 [2] : vector<4x8x8xf32> to vector<4x8xf32>
    %60 = vector.shape_cast %59 : vector<4x8xf32> to vector<4x8x1xf32>
    %61 = vector.broadcast %60 : vector<4x8x1xf32> to vector<4x8x8xf32>
    %62 = arith.subf %58, %61 : vector<4x8x8xf32>
    %63 = math.exp %62 : vector<4x8x8xf32>
    %cst_43 = arith.constant dense<0.000000e+00> : vector<4x8xf32>
    %64 = vector.multi_reduction <add>, %63, %cst_43 [2] : vector<4x8x8xf32> to vector<4x8xf32>
    %65 = vector.shape_cast %64 : vector<4x8xf32> to vector<4x8x1xf32>
    %66 = tpu.reciprocal %65 {approx = true} : vector<4x8x1xf32> -> vector<4x8x1xf32>
    %67 = vector.broadcast %66 : vector<4x8x1xf32> to vector<4x8x8xf32>
    %68 = arith.mulf %63, %67 : vector<4x8x8xf32>
    %69 = arith.truncf %68 : vector<4x8x8xf32> to vector<4x8x8xbf16>
    "tpu.trace_start"() <{level = 10 : i32, message = "hqk,hkd->hqd"}> : () -> ()
    %cst_44 = arith.constant dense<0.000000e+00> : vector<4x8x8xf32>
    %70 = tpu.matmul %69, %53, %cst_44 {dimension_numbers = #tpu.dot_dimension_numbers<[2], [1], [1], [2], [0, 0, 0, 1, 1, 2], [0], [0]>} : vector<4x8x8xbf16>, vector<4x8x8xbf16>, vector<4x8x8xf32> -> vector<4x8x8xf32>
    "tpu.trace_stop"() : () -> ()
    %71 = arith.truncf %70 : vector<4x8x8xf32> to vector<4x8x8xbf16>
    %c0_45 = arith.constant 0 : index
    %c0_46 = arith.constant 0 : index
    %c0_47 = arith.constant 0 : index
    %c0_48 = arith.constant 0 : index
    %72 = vector.load %arg11[%c0_45, %c0_46, %c0_47, %c0_48] : memref<2x4x8x32xbf16, #tpu.memory_space<vmem>>, vector<1x4x8x32xbf16>
    %73 = vector.shape_cast %72 : vector<1x4x8x32xbf16> to vector<4x8x32xbf16>
    "tpu.trace_start"() <{level = 10 : i32, message = "hsd,hdo->hso"}> : () -> ()
    %cst_49 = arith.constant dense<0.000000e+00> : vector<4x8x32xf32>
    %74 = tpu.matmul %71, %73, %cst_49 {dimension_numbers = #tpu.dot_dimension_numbers<[2], [1], [1], [2], [0, 0, 0, 1, 1, 2], [0], [0]>} : vector<4x8x8xbf16>, vector<4x8x32xbf16>, vector<4x8x32xf32> -> vector<4x8x32xf32>
    "tpu.trace_stop"() : () -> ()
    %cst_50 = arith.constant dense<0.000000e+00> : vector<8x32xf32>
    %75 = vector.multi_reduction <add>, %74, %cst_50 [0] : vector<4x8x32xf32> to vector<8x32xf32>
    %c0_51 = arith.constant 0 : index
    %c0_52 = arith.constant 0 : index
    %c0_53 = arith.constant 0 : index
    %76 = vector.load %arg12[%c0_51, %c0_52, %c0_53] : memref<2x1x32xf32, #tpu.memory_space<vmem>>, vector<1x1x32xf32>
    %77 = vector.shape_cast %76 : vector<1x1x32xf32> to vector<1x32xf32>
    %78 = vector.broadcast %77 : vector<1x32xf32> to vector<8x32xf32>
    %79 = arith.addf %75, %78 : vector<8x32xf32>
    %80 = arith.addf %25, %79 : vector<8x32xf32>
    %c0_54 = arith.constant 0 : index
    %c0_55 = arith.constant 0 : index
    %c0_56 = arith.constant 0 : index
    %81 = vector.load %arg13[%c0_54, %c0_55, %c0_56] : memref<2x1x32xf32, #tpu.memory_space<vmem>>, vector<1x1x32xf32>
    %82 = vector.shape_cast %81 : vector<1x1x32xf32> to vector<1x32xf32>
    %c0_57 = arith.constant 0 : index
    %c0_58 = arith.constant 0 : index
    %c0_59 = arith.constant 0 : index
    %83 = vector.load %arg14[%c0_57, %c0_58, %c0_59] : memref<2x1x32xf32, #tpu.memory_space<vmem>>, vector<1x1x32xf32>
    %84 = vector.shape_cast %83 : vector<1x1x32xf32> to vector<1x32xf32>
    %cst_60 = arith.constant dense<0.000000e+00> : vector<8xf32>
    %85 = vector.multi_reduction <add>, %80, %cst_60 [1] : vector<8x32xf32> to vector<8xf32>
    %86 = vector.shape_cast %85 : vector<8xf32> to vector<8x1xf32>
    %cst_61 = arith.constant 3.200000e+01 : f32
    %87 = vector.broadcast %cst_61 : f32 to vector<8x1xf32>
    %88 = arith.divf %86, %87 : vector<8x1xf32>
    %89 = vector.broadcast %88 : vector<8x1xf32> to vector<8x32xf32>
    %90 = arith.subf %80, %89 : vector<8x32xf32>
    %91 = arith.mulf %90, %90 : vector<8x32xf32>
    %cst_62 = arith.constant dense<0.000000e+00> : vector<8xf32>
    %92 = vector.multi_reduction <add>, %91, %cst_62 [1] : vector<8x32xf32> to vector<8xf32>
    %93 = vector.shape_cast %92 : vector<8xf32> to vector<8x1xf32>
    %cst_63 = arith.constant 3.200000e+01 : f32
    %94 = vector.broadcast %cst_63 : f32 to vector<8x1xf32>
    %95 = arith.divf %93, %94 : vector<8x1xf32>
    %96 = vector.broadcast %88 : vector<8x1xf32> to vector<8x32xf32>
    %97 = arith.subf %80, %96 : vector<8x32xf32>
    %cst_64 = arith.constant 9.99999996E-13 : f32
    %98 = vector.broadcast %cst_64 : f32 to vector<8x1xf32>
    %99 = arith.addf %95, %98 : vector<8x1xf32>
    %100 = math.rsqrt %99 : vector<8x1xf32>
    %101 = vector.broadcast %100 : vector<8x1xf32> to vector<8x32xf32>
    %102 = arith.mulf %97, %101 : vector<8x32xf32>
    %103 = vector.broadcast %82 : vector<1x32xf32> to vector<8x32xf32>
    %104 = arith.mulf %102, %103 : vector<8x32xf32>
    %105 = vector.broadcast %84 : vector<1x32xf32> to vector<8x32xf32>
    %106 = arith.addf %104, %105 : vector<8x32xf32>
    %107 = arith.truncf %106 : vector<8x32xf32> to vector<8x32xbf16>
    %c0_65 = arith.constant 0 : index
    %c0_66 = arith.constant 0 : index
    %c0_67 = arith.constant 0 : index
    %108 = vector.load %arg15[%c0_65, %c0_66, %c0_67] : memref<2x32x64xbf16, #tpu.memory_space<vmem>>, vector<1x32x64xbf16>
    %109 = vector.shape_cast %108 : vector<1x32x64xbf16> to vector<32x64xbf16>
    %cst_68 = arith.constant dense<0.000000e+00> : vector<8x64xf32>
    %110 = tpu.matmul %107, %109, %cst_68 {dimension_numbers = #tpu.dot_dimension_numbers<[1], [0], [0], [1], [0, 0, 1, 1], [], []>} : vector<8x32xbf16>, vector<32x64xbf16>, vector<8x64xf32> -> vector<8x64xf32>
    %c0_69 = arith.constant 0 : index
    %c0_70 = arith.constant 0 : index
    %c0_71 = arith.constant 0 : index
    %111 = vector.load %arg16[%c0_69, %c0_70, %c0_71] : memref<2x1x64xf32, #tpu.memory_space<vmem>>, vector<1x1x64xf32>
    %112 = vector.shape_cast %111 : vector<1x1x64xf32> to vector<1x64xf32>
    %113 = vector.broadcast %112 : vector<1x64xf32> to vector<8x64xf32>
    %114 = arith.addf %110, %113 : vector<8x64xf32>
    %cst_72 = arith.constant 5.000000e-01 : f32
    %115 = vector.broadcast %cst_72 : f32 to vector<8x64xf32>
    %116 = arith.mulf %115, %114 : vector<8x64xf32>
    %cst_73 = arith.constant 4.471500e-02 : f32
    %117 = vector.broadcast %cst_73 : f32 to vector<8x64xf32>
    %118 = arith.mulf %117, %114 : vector<8x64xf32>
    %119 = arith.mulf %118, %114 : vector<8x64xf32>
    %120 = arith.mulf %119, %114 : vector<8x64xf32>
    %121 = arith.addf %114, %120 : vector<8x64xf32>
    %cst_74 = arith.constant 0.797884583 : f32
    %122 = vector.broadcast %cst_74 : f32 to vector<8x64xf32>
    %123 = arith.mulf %122, %121 : vector<8x64xf32>
    %124 = math.tanh %123 : vector<8x64xf32>
    %cst_75 = arith.constant 1.000000e+00 : f32
    %125 = vector.broadcast %cst_75 : f32 to vector<8x64xf32>
    %126 = arith.addf %125, %124 : vector<8x64xf32>
    %127 = arith.mulf %116, %126 : vector<8x64xf32>
    %128 = arith.truncf %127 : vector<8x64xf32> to vector<8x64xbf16>
    %c0_76 = arith.constant 0 : index
    %c0_77 = arith.constant 0 : index
    %c0_78 = arith.constant 0 : index
    %129 = vector.load %arg17[%c0_76, %c0_77, %c0_78] : memref<2x64x32xbf16, #tpu.memory_space<vmem>>, vector<1x64x32xbf16>
    %130 = vector.shape_cast %129 : vector<1x64x32xbf16> to vector<64x32xbf16>
    %cst_79 = arith.constant dense<0.000000e+00> : vector<8x32xf32>
    %131 = tpu.matmul %128, %130, %cst_79 {dimension_numbers = #tpu.dot_dimension_numbers<[1], [0], [0], [1], [0, 0, 1, 1], [], []>} : vector<8x64xbf16>, vector<64x32xbf16>, vector<8x32xf32> -> vector<8x32xf32>
    %c0_80 = arith.constant 0 : index
    %c0_81 = arith.constant 0 : index
    %c0_82 = arith.constant 0 : index
    %132 = vector.load %arg18[%c0_80, %c0_81, %c0_82] : memref<2x1x32xf32, #tpu.memory_space<vmem>>, vector<1x1x32xf32>
    %133 = vector.shape_cast %132 : vector<1x1x32xf32> to vector<1x32xf32>
    %134 = vector.broadcast %133 : vector<1x32xf32> to vector<8x32xf32>
    %135 = arith.addf %131, %134 : vector<8x32xf32>
    %136 = arith.addf %106, %135 : vector<8x32xf32>
    %c0_83 = arith.constant 0 : index
    %c0_84 = arith.constant 0 : index
    %c0_85 = arith.constant 0 : index
    %137 = vector.load %arg19[%c0_83, %c0_84, %c0_85] : memref<2x1x32xf32, #tpu.memory_space<vmem>>, vector<1x1x32xf32>
    %138 = vector.shape_cast %137 : vector<1x1x32xf32> to vector<1x32xf32>
    %c0_86 = arith.constant 0 : index
    %c0_87 = arith.constant 0 : index
    %c0_88 = arith.constant 0 : index
    %139 = vector.load %arg20[%c0_86, %c0_87, %c0_88] : memref<2x1x32xf32, #tpu.memory_space<vmem>>, vector<1x1x32xf32>
    %140 = vector.shape_cast %139 : vector<1x1x32xf32> to vector<1x32xf32>
    %cst_89 = arith.constant dense<0.000000e+00> : vector<8xf32>
    %141 = vector.multi_reduction <add>, %136, %cst_89 [1] : vector<8x32xf32> to vector<8xf32>
    %142 = vector.shape_cast %141 : vector<8xf32> to vector<8x1xf32>
    %cst_90 = arith.constant 3.200000e+01 : f32
    %143 = vector.broadcast %cst_90 : f32 to vector<8x1xf32>
    %144 = arith.divf %142, %143 : vector<8x1xf32>
    %145 = vector.broadcast %144 : vector<8x1xf32> to vector<8x32xf32>
    %146 = arith.subf %136, %145 : vector<8x32xf32>
    %147 = arith.mulf %146, %146 : vector<8x32xf32>
    %cst_91 = arith.constant dense<0.000000e+00> : vector<8xf32>
    %148 = vector.multi_reduction <add>, %147, %cst_91 [1] : vector<8x32xf32> to vector<8xf32>
    %149 = vector.shape_cast %148 : vector<8xf32> to vector<8x1xf32>
    %cst_92 = arith.constant 3.200000e+01 : f32
    %150 = vector.broadcast %cst_92 : f32 to vector<8x1xf32>
    %151 = arith.divf %149, %150 : vector<8x1xf32>
    %152 = vector.broadcast %144 : vector<8x1xf32> to vector<8x32xf32>
    %153 = arith.subf %136, %152 : vector<8x32xf32>
    %cst_93 = arith.constant 9.99999996E-13 : f32
    %154 = vector.broadcast %cst_93 : f32 to vector<8x1xf32>
    %155 = arith.addf %151, %154 : vector<8x1xf32>
    %156 = math.rsqrt %155 : vector<8x1xf32>
    %157 = vector.broadcast %156 : vector<8x1xf32> to vector<8x32xf32>
    %158 = arith.mulf %153, %157 : vector<8x32xf32>
    %159 = vector.broadcast %138 : vector<1x32xf32> to vector<8x32xf32>
    %160 = arith.mulf %158, %159 : vector<8x32xf32>
    %161 = vector.broadcast %140 : vector<1x32xf32> to vector<8x32xf32>
    %162 = arith.addf %160, %161 : vector<8x32xf32>
    %163 = arith.truncf %162 : vector<8x32xf32> to vector<8x32xbf16>
    %164 = vector.shape_cast %163 : vector<8x32xbf16> to vector<1x8x32xbf16>
    %165 = vector.broadcast %164 : vector<1x8x32xbf16> to vector<4x8x32xbf16>
    %c1 = arith.constant 1 : index
    %c0_94 = arith.constant 0 : index
    %c0_95 = arith.constant 0 : index
    %c0_96 = arith.constant 0 : index
    %166 = vector.load %arg5[%c1, %c0_94, %c0_95, %c0_96] : memref<2x4x32x8xbf16, #tpu.memory_space<vmem>>, vector<1x4x32x8xbf16>
    %167 = vector.shape_cast %166 : vector<1x4x32x8xbf16> to vector<4x32x8xbf16>
    "tpu.trace_start"() <{level = 10 : i32, message = "hsd,hdk->hsk"}> : () -> ()
    %cst_97 = arith.constant dense<0.000000e+00> : vector<4x8x8xf32>
    %168 = tpu.matmul %165, %167, %cst_97 {dimension_numbers = #tpu.dot_dimension_numbers<[2], [1], [1], [2], [0, 0, 0, 1, 1, 2], [0], [0]>} : vector<4x8x32xbf16>, vector<4x32x8xbf16>, vector<4x8x8xf32> -> vector<4x8x8xf32>
    "tpu.trace_stop"() : () -> ()
    %c1_98 = arith.constant 1 : index
    %c0_99 = arith.constant 0 : index
    %c0_100 = arith.constant 0 : index
    %c0_101 = arith.constant 0 : index
    %169 = vector.load %arg6[%c1_98, %c0_99, %c0_100, %c0_101] : memref<2x4x1x8xf32, #tpu.memory_space<vmem>>, vector<1x4x1x8xf32>
    %170 = vector.shape_cast %169 : vector<1x4x1x8xf32> to vector<4x1x8xf32>
    %171 = vector.broadcast %170 : vector<4x1x8xf32> to vector<4x8x8xf32>
    %172 = arith.addf %168, %171 : vector<4x8x8xf32>
    %173 = arith.truncf %172 : vector<4x8x8xf32> to vector<4x8x8xbf16>
    %c1_102 = arith.constant 1 : index
    %c0_103 = arith.constant 0 : index
    %c0_104 = arith.constant 0 : index
    %c0_105 = arith.constant 0 : index
    %174 = vector.load %arg7[%c1_102, %c0_103, %c0_104, %c0_105] : memref<2x4x32x8xbf16, #tpu.memory_space<vmem>>, vector<1x4x32x8xbf16>
    %175 = vector.shape_cast %174 : vector<1x4x32x8xbf16> to vector<4x32x8xbf16>
    "tpu.trace_start"() <{level = 10 : i32, message = "hsd,hdk->hsk"}> : () -> ()
    %cst_106 = arith.constant dense<0.000000e+00> : vector<4x8x8xf32>
    %176 = tpu.matmul %165, %175, %cst_106 {dimension_numbers = #tpu.dot_dimension_numbers<[2], [1], [1], [2], [0, 0, 0, 1, 1, 2], [0], [0]>} : vector<4x8x32xbf16>, vector<4x32x8xbf16>, vector<4x8x8xf32> -> vector<4x8x8xf32>
    "tpu.trace_stop"() : () -> ()
    %c1_107 = arith.constant 1 : index
    %c0_108 = arith.constant 0 : index
    %c0_109 = arith.constant 0 : index
    %c0_110 = arith.constant 0 : index
    %177 = vector.load %arg8[%c1_107, %c0_108, %c0_109, %c0_110] : memref<2x4x1x8xf32, #tpu.memory_space<vmem>>, vector<1x4x1x8xf32>
    %178 = vector.shape_cast %177 : vector<1x4x1x8xf32> to vector<4x1x8xf32>
    %179 = vector.broadcast %178 : vector<4x1x8xf32> to vector<4x8x8xf32>
    %180 = arith.addf %176, %179 : vector<4x8x8xf32>
    %181 = arith.truncf %180 : vector<4x8x8xf32> to vector<4x8x8xbf16>
    %c1_111 = arith.constant 1 : index
    %c0_112 = arith.constant 0 : index
    %c0_113 = arith.constant 0 : index
    %c0_114 = arith.constant 0 : index
    %182 = vector.load %arg9[%c1_111, %c0_112, %c0_113, %c0_114] : memref<2x4x32x8xbf16, #tpu.memory_space<vmem>>, vector<1x4x32x8xbf16>
    %183 = vector.shape_cast %182 : vector<1x4x32x8xbf16> to vector<4x32x8xbf16>
    "tpu.trace_start"() <{level = 10 : i32, message = "hsd,hdk->hsk"}> : () -> ()
    %cst_115 = arith.constant dense<0.000000e+00> : vector<4x8x8xf32>
    %184 = tpu.matmul %165, %183, %cst_115 {dimension_numbers = #tpu.dot_dimension_numbers<[2], [1], [1], [2], [0, 0, 0, 1, 1, 2], [0], [0]>} : vector<4x8x32xbf16>, vector<4x32x8xbf16>, vector<4x8x8xf32> -> vector<4x8x8xf32>
    "tpu.trace_stop"() : () -> ()
    %c1_116 = arith.constant 1 : index
    %c0_117 = arith.constant 0 : index
    %c0_118 = arith.constant 0 : index
    %c0_119 = arith.constant 0 : index
    %185 = vector.load %arg10[%c1_116, %c0_117, %c0_118, %c0_119] : memref<2x4x1x8xf32, #tpu.memory_space<vmem>>, vector<1x4x1x8xf32>
    %186 = vector.shape_cast %185 : vector<1x4x1x8xf32> to vector<4x1x8xf32>
    %187 = vector.broadcast %186 : vector<4x1x8xf32> to vector<4x8x8xf32>
    %188 = arith.addf %184, %187 : vector<4x8x8xf32>
    %189 = arith.truncf %188 : vector<4x8x8xf32> to vector<4x8x8xbf16>
    "tpu.trace_start"() <{level = 10 : i32, message = "hqd,hkd->hqk"}> : () -> ()
    %cst_120 = arith.constant dense<0.000000e+00> : vector<4x8x8xf32>
    %190 = tpu.matmul %173, %181, %cst_120 {dimension_numbers = #tpu.dot_dimension_numbers<[2], [2], [1], [1], [0, 0, 0, 1, 1, 1], [0], [0]>} : vector<4x8x8xbf16>, vector<4x8x8xbf16>, vector<4x8x8xf32> -> vector<4x8x8xf32>
    "tpu.trace_stop"() : () -> ()
    %cst_121 = arith.constant 0.353553385 : f32
    %191 = vector.broadcast %cst_121 : f32 to vector<4x8x8xf32>
    %192 = arith.mulf %190, %191 : vector<4x8x8xf32>
    %193 = vector.broadcast %26 : vector<1x1x8xf32> to vector<4x8x8xf32>
    %194 = arith.addf %192, %193 : vector<4x8x8xf32>
    %cst_122 = arith.constant dense<0xFF800000> : vector<4x8xf32>
    %195 = vector.multi_reduction <maximumf>, %194, %cst_122 [2] : vector<4x8x8xf32> to vector<4x8xf32>
    %196 = vector.shape_cast %195 : vector<4x8xf32> to vector<4x8x1xf32>
    %197 = vector.broadcast %196 : vector<4x8x1xf32> to vector<4x8x8xf32>
    %198 = arith.subf %194, %197 : vector<4x8x8xf32>
    %199 = math.exp %198 : vector<4x8x8xf32>
    %cst_123 = arith.constant dense<0.000000e+00> : vector<4x8xf32>
    %200 = vector.multi_reduction <add>, %199, %cst_123 [2] : vector<4x8x8xf32> to vector<4x8xf32>
    %201 = vector.shape_cast %200 : vector<4x8xf32> to vector<4x8x1xf32>
    %202 = tpu.reciprocal %201 {approx = true} : vector<4x8x1xf32> -> vector<4x8x1xf32>
    %203 = vector.broadcast %202 : vector<4x8x1xf32> to vector<4x8x8xf32>
    %204 = arith.mulf %199, %203 : vector<4x8x8xf32>
    %205 = arith.truncf %204 : vector<4x8x8xf32> to vector<4x8x8xbf16>
    "tpu.trace_start"() <{level = 10 : i32, message = "hqk,hkd->hqd"}> : () -> ()
    %cst_124 = arith.constant dense<0.000000e+00> : vector<4x8x8xf32>
    %206 = tpu.matmul %205, %189, %cst_124 {dimension_numbers = #tpu.dot_dimension_numbers<[2], [1], [1], [2], [0, 0, 0, 1, 1, 2], [0], [0]>} : vector<4x8x8xbf16>, vector<4x8x8xbf16>, vector<4x8x8xf32> -> vector<4x8x8xf32>
    "tpu.trace_stop"() : () -> ()
    %207 = arith.truncf %206 : vector<4x8x8xf32> to vector<4x8x8xbf16>
    %c1_125 = arith.constant 1 : index
    %c0_126 = arith.constant 0 : index
    %c0_127 = arith.constant 0 : index
    %c0_128 = arith.constant 0 : index
    %208 = vector.load %arg11[%c1_125, %c0_126, %c0_127, %c0_128] : memref<2x4x8x32xbf16, #tpu.memory_space<vmem>>, vector<1x4x8x32xbf16>
    %209 = vector.shape_cast %208 : vector<1x4x8x32xbf16> to vector<4x8x32xbf16>
    "tpu.trace_start"() <{level = 10 : i32, message = "hsd,hdo->hso"}> : () -> ()
    %cst_129 = arith.constant dense<0.000000e+00> : vector<4x8x32xf32>
    %210 = tpu.matmul %207, %209, %cst_129 {dimension_numbers = #tpu.dot_dimension_numbers<[2], [1], [1], [2], [0, 0, 0, 1, 1, 2], [0], [0]>} : vector<4x8x8xbf16>, vector<4x8x32xbf16>, vector<4x8x32xf32> -> vector<4x8x32xf32>
    "tpu.trace_stop"() : () -> ()
    %cst_130 = arith.constant dense<0.000000e+00> : vector<8x32xf32>
    %211 = vector.multi_reduction <add>, %210, %cst_130 [0] : vector<4x8x32xf32> to vector<8x32xf32>
    %c1_131 = arith.constant 1 : index
    %c0_132 = arith.constant 0 : index
    %c0_133 = arith.constant 0 : index
    %212 = vector.load %arg12[%c1_131, %c0_132, %c0_133] : memref<2x1x32xf32, #tpu.memory_space<vmem>>, vector<1x1x32xf32>
    %213 = vector.shape_cast %212 : vector<1x1x32xf32> to vector<1x32xf32>
    %214 = vector.broadcast %213 : vector<1x32xf32> to vector<8x32xf32>
    %215 = arith.addf %211, %214 : vector<8x32xf32>
    %216 = arith.addf %162, %215 : vector<8x32xf32>
    %c1_134 = arith.constant 1 : index
    %c0_135 = arith.constant 0 : index
    %c0_136 = arith.constant 0 : index
    %217 = vector.load %arg13[%c1_134, %c0_135, %c0_136] : memref<2x1x32xf32, #tpu.memory_space<vmem>>, vector<1x1x32xf32>
    %218 = vector.shape_cast %217 : vector<1x1x32xf32> to vector<1x32xf32>
    %c1_137 = arith.constant 1 : index
    %c0_138 = arith.constant 0 : index
    %c0_139 = arith.constant 0 : index
    %219 = vector.load %arg14[%c1_137, %c0_138, %c0_139] : memref<2x1x32xf32, #tpu.memory_space<vmem>>, vector<1x1x32xf32>
    %220 = vector.shape_cast %219 : vector<1x1x32xf32> to vector<1x32xf32>
    %cst_140 = arith.constant dense<0.000000e+00> : vector<8xf32>
    %221 = vector.multi_reduction <add>, %216, %cst_140 [1] : vector<8x32xf32> to vector<8xf32>
    %222 = vector.shape_cast %221 : vector<8xf32> to vector<8x1xf32>
    %cst_141 = arith.constant 3.200000e+01 : f32
    %223 = vector.broadcast %cst_141 : f32 to vector<8x1xf32>
    %224 = arith.divf %222, %223 : vector<8x1xf32>
    %225 = vector.broadcast %224 : vector<8x1xf32> to vector<8x32xf32>
    %226 = arith.subf %216, %225 : vector<8x32xf32>
    %227 = arith.mulf %226, %226 : vector<8x32xf32>
    %cst_142 = arith.constant dense<0.000000e+00> : vector<8xf32>
    %228 = vector.multi_reduction <add>, %227, %cst_142 [1] : vector<8x32xf32> to vector<8xf32>
    %229 = vector.shape_cast %228 : vector<8xf32> to vector<8x1xf32>
    %cst_143 = arith.constant 3.200000e+01 : f32
    %230 = vector.broadcast %cst_143 : f32 to vector<8x1xf32>
    %231 = arith.divf %229, %230 : vector<8x1xf32>
    %232 = vector.broadcast %224 : vector<8x1xf32> to vector<8x32xf32>
    %233 = arith.subf %216, %232 : vector<8x32xf32>
    %cst_144 = arith.constant 9.99999996E-13 : f32
    %234 = vector.broadcast %cst_144 : f32 to vector<8x1xf32>
    %235 = arith.addf %231, %234 : vector<8x1xf32>
    %236 = math.rsqrt %235 : vector<8x1xf32>
    %237 = vector.broadcast %236 : vector<8x1xf32> to vector<8x32xf32>
    %238 = arith.mulf %233, %237 : vector<8x32xf32>
    %239 = vector.broadcast %218 : vector<1x32xf32> to vector<8x32xf32>
    %240 = arith.mulf %238, %239 : vector<8x32xf32>
    %241 = vector.broadcast %220 : vector<1x32xf32> to vector<8x32xf32>
    %242 = arith.addf %240, %241 : vector<8x32xf32>
    %243 = arith.truncf %242 : vector<8x32xf32> to vector<8x32xbf16>
    %c1_145 = arith.constant 1 : index
    %c0_146 = arith.constant 0 : index
    %c0_147 = arith.constant 0 : index
    %244 = vector.load %arg15[%c1_145, %c0_146, %c0_147] : memref<2x32x64xbf16, #tpu.memory_space<vmem>>, vector<1x32x64xbf16>
    %245 = vector.shape_cast %244 : vector<1x32x64xbf16> to vector<32x64xbf16>
    %cst_148 = arith.constant dense<0.000000e+00> : vector<8x64xf32>
    %246 = tpu.matmul %243, %245, %cst_148 {dimension_numbers = #tpu.dot_dimension_numbers<[1], [0], [0], [1], [0, 0, 1, 1], [], []>} : vector<8x32xbf16>, vector<32x64xbf16>, vector<8x64xf32> -> vector<8x64xf32>
    %c1_149 = arith.constant 1 : index
    %c0_150 = arith.constant 0 : index
    %c0_151 = arith.constant 0 : index
    %247 = vector.load %arg16[%c1_149, %c0_150, %c0_151] : memref<2x1x64xf32, #tpu.memory_space<vmem>>, vector<1x1x64xf32>
    %248 = vector.shape_cast %247 : vector<1x1x64xf32> to vector<1x64xf32>
    %249 = vector.broadcast %248 : vector<1x64xf32> to vector<8x64xf32>
    %250 = arith.addf %246, %249 : vector<8x64xf32>
    %cst_152 = arith.constant 5.000000e-01 : f32
    %251 = vector.broadcast %cst_152 : f32 to vector<8x64xf32>
    %252 = arith.mulf %251, %250 : vector<8x64xf32>
    %cst_153 = arith.constant 4.471500e-02 : f32
    %253 = vector.broadcast %cst_153 : f32 to vector<8x64xf32>
    %254 = arith.mulf %253, %250 : vector<8x64xf32>
    %255 = arith.mulf %254, %250 : vector<8x64xf32>
    %256 = arith.mulf %255, %250 : vector<8x64xf32>
    %257 = arith.addf %250, %256 : vector<8x64xf32>
    %cst_154 = arith.constant 0.797884583 : f32
    %258 = vector.broadcast %cst_154 : f32 to vector<8x64xf32>
    %259 = arith.mulf %258, %257 : vector<8x64xf32>
    %260 = math.tanh %259 : vector<8x64xf32>
    %cst_155 = arith.constant 1.000000e+00 : f32
    %261 = vector.broadcast %cst_155 : f32 to vector<8x64xf32>
    %262 = arith.addf %261, %260 : vector<8x64xf32>
    %263 = arith.mulf %252, %262 : vector<8x64xf32>
    %264 = arith.truncf %263 : vector<8x64xf32> to vector<8x64xbf16>
    %c1_156 = arith.constant 1 : index
    %c0_157 = arith.constant 0 : index
    %c0_158 = arith.constant 0 : index
    %265 = vector.load %arg17[%c1_156, %c0_157, %c0_158] : memref<2x64x32xbf16, #tpu.memory_space<vmem>>, vector<1x64x32xbf16>
    %266 = vector.shape_cast %265 : vector<1x64x32xbf16> to vector<64x32xbf16>
    %cst_159 = arith.constant dense<0.000000e+00> : vector<8x32xf32>
    %267 = tpu.matmul %264, %266, %cst_159 {dimension_numbers = #tpu.dot_dimension_numbers<[1], [0], [0], [1], [0, 0, 1, 1], [], []>} : vector<8x64xbf16>, vector<64x32xbf16>, vector<8x32xf32> -> vector<8x32xf32>
    %c1_160 = arith.constant 1 : index
    %c0_161 = arith.constant 0 : index
    %c0_162 = arith.constant 0 : index
    %268 = vector.load %arg18[%c1_160, %c0_161, %c0_162] : memref<2x1x32xf32, #tpu.memory_space<vmem>>, vector<1x1x32xf32>
    %269 = vector.shape_cast %268 : vector<1x1x32xf32> to vector<1x32xf32>
    %270 = vector.broadcast %269 : vector<1x32xf32> to vector<8x32xf32>
    %271 = arith.addf %267, %270 : vector<8x32xf32>
    %272 = arith.addf %242, %271 : vector<8x32xf32>
    %c1_163 = arith.constant 1 : index
    %c0_164 = arith.constant 0 : index
    %c0_165 = arith.constant 0 : index
    %273 = vector.load %arg19[%c1_163, %c0_164, %c0_165] : memref<2x1x32xf32, #tpu.memory_space<vmem>>, vector<1x1x32xf32>
    %274 = vector.shape_cast %273 : vector<1x1x32xf32> to vector<1x32xf32>
    %c1_166 = arith.constant 1 : index
    %c0_167 = arith.constant 0 : index
    %c0_168 = arith.constant 0 : index
    %275 = vector.load %arg20[%c1_166, %c0_167, %c0_168] : memref<2x1x32xf32, #tpu.memory_space<vmem>>, vector<1x1x32xf32>
    %276 = vector.shape_cast %275 : vector<1x1x32xf32> to vector<1x32xf32>
    %cst_169 = arith.constant dense<0.000000e+00> : vector<8xf32>
    %277 = vector.multi_reduction <add>, %272, %cst_169 [1] : vector<8x32xf32> to vector<8xf32>
    %278 = vector.shape_cast %277 : vector<8xf32> to vector<8x1xf32>
    %cst_170 = arith.constant 3.200000e+01 : f32
    %279 = vector.broadcast %cst_170 : f32 to vector<8x1xf32>
    %280 = arith.divf %278, %279 : vector<8x1xf32>
    %281 = vector.broadcast %280 : vector<8x1xf32> to vector<8x32xf32>
    %282 = arith.subf %272, %281 : vector<8x32xf32>
    %283 = arith.mulf %282, %282 : vector<8x32xf32>
    %cst_171 = arith.constant dense<0.000000e+00> : vector<8xf32>
    %284 = vector.multi_reduction <add>, %283, %cst_171 [1] : vector<8x32xf32> to vector<8xf32>
    %285 = vector.shape_cast %284 : vector<8xf32> to vector<8x1xf32>
    %cst_172 = arith.constant 3.200000e+01 : f32
    %286 = vector.broadcast %cst_172 : f32 to vector<8x1xf32>
    %287 = arith.divf %285, %286 : vector<8x1xf32>
    %288 = vector.broadcast %280 : vector<8x1xf32> to vector<8x32xf32>
    %289 = arith.subf %272, %288 : vector<8x32xf32>
    %cst_173 = arith.constant 9.99999996E-13 : f32
    %290 = vector.broadcast %cst_173 : f32 to vector<8x1xf32>
    %291 = arith.addf %287, %290 : vector<8x1xf32>
    %292 = math.rsqrt %291 : vector<8x1xf32>
    %293 = vector.broadcast %292 : vector<8x1xf32> to vector<8x32xf32>
    %294 = arith.mulf %289, %293 : vector<8x32xf32>
    %295 = vector.broadcast %274 : vector<1x32xf32> to vector<8x32xf32>
    %296 = arith.mulf %294, %295 : vector<8x32xf32>
    %297 = vector.broadcast %276 : vector<1x32xf32> to vector<8x32xf32>
    %298 = arith.addf %296, %297 : vector<8x32xf32>
    %299 = vector.extract_strided_slice %298 {offsets = [0, 0], sizes = [1, 32], strides = [1, 1]} : vector<8x32xf32> to vector<1x32xf32>
    %c0_174 = arith.constant 0 : index
    %c0_175 = arith.constant 0 : index
    %300 = vector.load %arg21[%c0_174, %c0_175] : memref<1x32xf32, #tpu.memory_space<vmem>>, vector<1x32xf32>
    %301 = arith.mulf %299, %300 : vector<1x32xf32>
    %cst_176 = arith.constant dense<0.000000e+00> : vector<1xf32>
    %302 = vector.multi_reduction <add>, %301, %cst_176 [1] : vector<1x32xf32> to vector<1xf32>
    %303 = vector.shape_cast %302 : vector<1xf32> to vector<1x1xf32>
    %c0_177 = arith.constant 0 : index
    %c0_178 = arith.constant 0 : index
    %304 = vector.load %arg22[%c0_177, %c0_178] : memref<1x1xf32, #tpu.memory_space<vmem>>, vector<1x1xf32>
    %305 = arith.addf %303, %304 : vector<1x1xf32>
    %306 = vector.shape_cast %305 : vector<1x1xf32> to vector<1x1x1xf32>
    %c0_179 = arith.constant 0 : index
    %c0_180 = arith.constant 0 : index
    %c0_181 = arith.constant 0 : index
    %307 = vector.load %arg23[%c0_179, %c0_180, %c0_181] : memref<1x1x1xf32, #tpu.memory_space<vmem>>, vector<1x1x1xf32>
    tpu.vector_store %arg23[%c0_179, %c0_180, %c0_181], %306 {strides = array<i32>} : memref<1x1x1xf32, #tpu.memory_space<vmem>>, vector<1x1x1xf32>,
    return
  }
  func.func @transform_0(%arg0: i32) -> (i32, i32, i32) {
    %c0_i32 = arith.constant 0 : i32
    %c0_i32_0 = arith.constant 0 : i32
    %c0_i32_1 = arith.constant 0 : i32
    return %arg0, %c0_i32, %c0_i32_0 : i32, i32, i32
  }
  func.func @transform_1(%arg0: i32) -> (i32, i32, i32) {
    %c0_i32 = arith.constant 0 : i32
    %c0_i32_0 = arith.constant 0 : i32
    %c0_i32_1 = arith.constant 0 : i32
    return %arg0, %c0_i32, %c0_i32_0 : i32, i32, i32
  }
  func.func @transform_2(%arg0: i32) -> (i32, i32) {
    %c0_i32 = arith.constant 0 : i32
    %c0_i32_0 = arith.constant 0 : i32
    %c0_i32_1 = arith.constant 0 : i32
    return %c0_i32, %c0_i32_0 : i32, i32
  }
  func.func @transform_3(%arg0: i32) -> (i32, i32) {
    %c0_i32 = arith.constant 0 : i32
    %c0_i32_0 = arith.constant 0 : i32
    %c0_i32_1 = arith.constant 0 : i32
    return %c0_i32, %c0_i32_0 : i32, i32
  }
  func.func @transform_4(%arg0: i32) -> (i32, i32, i32, i32) {
    %c0_i32 = arith.constant 0 : i32
    %c0_i32_0 = arith.constant 0 : i32
    %c0_i32_1 = arith.constant 0 : i32
    %c0_i32_2 = arith.constant 0 : i32
    %c0_i32_3 = arith.constant 0 : i32
    return %c0_i32, %c0_i32_0, %c0_i32_1, %c0_i32_2 : i32, i32, i32, i32
  }
  func.func @transform_5(%arg0: i32) -> (i32, i32, i32, i32) {
    %c0_i32 = arith.constant 0 : i32
    %c0_i32_0 = arith.constant 0 : i32
    %c0_i32_1 = arith.constant 0 : i32
    %c0_i32_2 = arith.constant 0 : i32
    %c0_i32_3 = arith.constant 0 : i32
    return %c0_i32, %c0_i32_0, %c0_i32_1, %c0_i32_2 : i32, i32, i32, i32
  }
  func.func @transform_6(%arg0: i32) -> (i32, i32, i32, i32) {
    %c0_i32 = arith.constant 0 : i32
    %c0_i32_0 = arith.constant 0 : i32
    %c0_i32_1 = arith.constant 0 : i32
    %c0_i32_2 = arith.constant 0 : i32
    %c0_i32_3 = arith.constant 0 : i32
    return %c0_i32, %c0_i32_0, %c0_i32_1, %c0_i32_2 : i32, i32, i32, i32
  }
  func.func @transform_7(%arg0: i32) -> (i32, i32, i32, i32) {
    %c0_i32 = arith.constant 0 : i32
    %c0_i32_0 = arith.constant 0 : i32
    %c0_i32_1 = arith.constant 0 : i32
    %c0_i32_2 = arith.constant 0 : i32
    %c0_i32_3 = arith.constant 0 : i32
    return %c0_i32, %c0_i32_0, %c0_i32_1, %c0_i32_2 : i32, i32, i32, i32
  }
  func.func @transform_8(%arg0: i32) -> (i32, i32, i32, i32) {
    %c0_i32 = arith.constant 0 : i32
    %c0_i32_0 = arith.constant 0 : i32
    %c0_i32_1 = arith.constant 0 : i32
    %c0_i32_2 = arith.constant 0 : i32
    %c0_i32_3 = arith.constant 0 : i32
    return %c0_i32, %c0_i32_0, %c0_i32_1, %c0_i32_2 : i32, i32, i32, i32
  }
  func.func @transform_9(%arg0: i32) -> (i32, i32, i32, i32) {
    %c0_i32 = arith.constant 0 : i32
    %c0_i32_0 = arith.constant 0 : i32
    %c0_i32_1 = arith.constant 0 : i32
    %c0_i32_2 = arith.constant 0 : i32
    %c0_i32_3 = arith.constant 0 : i32
    return %c0_i32, %c0_i32_0, %c0_i32_1, %c0_i32_2 : i32, i32, i32, i32
  }
  func.func @transform_10(%arg0: i32) -> (i32, i32, i32, i32) {
    %c0_i32 = arith.constant 0 : i32
    %c0_i32_0 = arith.constant 0 : i32
    %c0_i32_1 = arith.constant 0 : i32
    %c0_i32_2 = arith.constant 0 : i32
    %c0_i32_3 = arith.constant 0 : i32
    return %c0_i32, %c0_i32_0, %c0_i32_1, %c0_i32_2 : i32, i32, i32, i32
  }
  func.func @transform_11(%arg0: i32) -> (i32, i32, i32) {
    %c0_i32 = arith.constant 0 : i32
    %c0_i32_0 = arith.constant 0 : i32
    %c0_i32_1 = arith.constant 0 : i32
    %c0_i32_2 = arith.constant 0 : i32
    return %c0_i32, %c0_i32_0, %c0_i32_1 : i32, i32, i32
  }
  func.func @transform_12(%arg0: i32) -> (i32, i32, i32) {
    %c0_i32 = arith.constant 0 : i32
    %c0_i32_0 = arith.constant 0 : i32
    %c0_i32_1 = arith.constant 0 : i32
    %c0_i32_2 = arith.constant 0 : i32
    return %c0_i32, %c0_i32_0, %c0_i32_1 : i32, i32, i32
  }
  func.func @transform_13(%arg0: i32) -> (i32, i32, i32) {
    %c0_i32 = arith.constant 0 : i32
    %c0_i32_0 = arith.constant 0 : i32
    %c0_i32_1 = arith.constant 0 : i32
    %c0_i32_2 = arith.constant 0 : i32
    return %c0_i32, %c0_i32_0, %c0_i32_1 : i32, i32, i32
  }
  func.func @transform_14(%arg0: i32) -> (i32, i32, i32) {
    %c0_i32 = arith.constant 0 : i32
    %c0_i32_0 = arith.constant 0 : i32
    %c0_i32_1 = arith.constant 0 : i32
    %c0_i32_2 = arith.constant 0 : i32
    return %c0_i32, %c0_i32_0, %c0_i32_1 : i32, i32, i32
  }
  func.func @transform_15(%arg0: i32) -> (i32, i32, i32) {
    %c0_i32 = arith.constant 0 : i32
    %c0_i32_0 = arith.constant 0 : i32
    %c0_i32_1 = arith.constant 0 : i32
    %c0_i32_2 = arith.constant 0 : i32
    return %c0_i32, %c0_i32_0, %c0_i32_1 : i32, i32, i32
  }
  func.func @transform_16(%arg0: i32) -> (i32, i32, i32) {
    %c0_i32 = arith.constant 0 : i32
    %c0_i32_0 = arith.constant 0 : i32
    %c0_i32_1 = arith.constant 0 : i32
    %c0_i32_2 = arith.constant 0 : i32
    return %c0_i32, %c0_i32_0, %c0_i32_1 : i32, i32, i32
  }
  func.func @transform_17(%arg0: i32) -> (i32, i32, i32) {
    %c0_i32 = arith.constant 0 : i32
    %c0_i32_0 = arith.constant 0 : i32
    %c0_i32_1 = arith.constant 0 : i32
    %c0_i32_2 = arith.constant 0 : i32
    return %c0_i32, %c0_i32_0, %c0_i32_1 : i32, i32, i32
  }
  func.func @transform_18(%arg0: i32) -> (i32, i32, i32) {
    %c0_i32 = arith.constant 0 : i32
    %c0_i32_0 = arith.constant 0 : i32
    %c0_i32_1 = arith.constant 0 : i32
    %c0_i32_2 = arith.constant 0 : i32
    return %c0_i32, %c0_i32_0, %c0_i32_1 : i32, i32, i32
  }
  func.func @transform_19(%arg0: i32) -> (i32, i32, i32) {
    %c0_i32 = arith.constant 0 : i32
    %c0_i32_0 = arith.constant 0 : i32
    %c0_i32_1 = arith.constant 0 : i32
    %c0_i32_2 = arith.constant 0 : i32
    return %c0_i32, %c0_i32_0, %c0_i32_1 : i32, i32, i32
  }
  func.func @transform_20(%arg0: i32) -> (i32, i32) {
    %c0_i32 = arith.constant 0 : i32
    %c0_i32_0 = arith.constant 0 : i32
    %c0_i32_1 = arith.constant 0 : i32
    return %c0_i32, %c0_i32_0 : i32, i32
  }
  func.func @transform_21(%arg0: i32) -> (i32, i32) {
    %c0_i32 = arith.constant 0 : i32
    %c0_i32_0 = arith.constant 0 : i32
    %c0_i32_1 = arith.constant 0 : i32
    return %c0_i32, %c0_i32_0 : i32, i32
  }
  func.func @transform_22(%arg0: i32) -> (i32, i32, i32) {
    %c0_i32 = arith.constant 0 : i32
    %c0_i32_0 = arith.constant 0 : i32
    %c0_i32_1 = arith.constant 0 : i32
    return %arg0, %c0_i32, %c0_i32_0 : i32, i32, i32
  }
}

</mosaic_0001>

<bundles_post_ra>
// kernel: rouge_kl_model.1
= control target key start
LH: loop header
LB: loop body
LE: loop exit
PB: predicated region body
PF: predicated region fallthrough
CT: control target
= control target key end

     0   :  { %s5062_s29 = smov 0   ;;  %s5772_s0 = inlined_call_operand.vmem [shape: f32[2,8,32], index: 0, kind: input, shape index: {}]   ;;  %s5773_s1 = inlined_call_operand.vmem [shape: f32[2,1,8], index: 1, kind: input, shape index: {}]   ;;  %s5774_s2 = inlined_call_operand.vmem [shape: f32[1,32], index: 2, kind: input, shape index: {}]   ;;  %s5775_s3 = inlined_call_operand.vmem [shape: f32[1,32], index: 3, kind: input, shape index: {}]   ;;  %s5776_s4 = inlined_call_operand.vmem [shape: bf16[2,4,32,8], index: 4, kind: input, shape index: {}]   ;;  %s5777_s5 = inlined_call_operand.vmem [shape: f32[2,4,1,8], index: 5, kind: input, shape index: {}]   ;;  %s5778_s6 = inlined_call_operand.vmem [shape: bf16[2,4,32,8], index: 6, kind: input, shape index: {}]   ;;  %s5779_s7 = inlined_call_operand.vmem [shape: f32[2,4,1,8], index: 7, kind: input, shape index: {}]   ;;  %s5780_s8 = inlined_call_operand.vmem [shape: bf16[2,4,32,8], index: 8, kind: input, shape index: {}]   ;;  %s5781_s9 = inlined_call_operand.vmem [shape: f32[2,4,1,8], index: 9, kind: input, shape index: {}]   ;;  %s5782_s10 = inlined_call_operand.vmem [shape: bf16[2,4,8,32], index: 10, kind: input, shape index: {}]   ;;  %s5783_s11 = inlined_call_operand.vmem [shape: f32[2,1,32], index: 11, kind: input, shape index: {}]   ;;  %s5784_s12 = inlined_call_operand.vmem [shape: f32[2,1,32], index: 12, kind: input, shape index: {}]   ;;  %s5785_s13 = inlined_call_operand.vmem [shape: f32[2,1,32], index: 13, kind: input, shape index: {}]   ;;  %s5786_s14 = inlined_call_operand.vmem [shape: bf16[2,32,64], index: 14, kind: input, shape index: {}]   ;;  %s5787_s15 = inlined_call_operand.vmem [shape: f32[2,1,64], index: 15, kind: input, shape index: {}]   ;;  %s5788_s16 = inlined_call_operand.vmem [shape: bf16[2,64,32], index: 16, kind: input, shape index: {}]   ;;  %s5789_s17 = inlined_call_operand.vmem [shape: f32[2,1,32], index: 17, kind: input, shape index: {}]   ;;  %s5790_s18 = inlined_call_operand.vmem [shape: f32[2,1,32], index: 18, kind: input, shape index: {}]   ;;  %s5791_s19 = inlined_call_operand.vmem [shape: f32[2,1,32], index: 19, kind: input, shape index: {}]   ;;  %s5792_s20 = inlined_call_operand.vmem [shape: f32[1,32], index: 20, kind: input, shape index: {}]   ;;  %s5793_s21 = inlined_call_operand.<no memory space> [shape: f32[1,1], index: 21, kind: input, shape index: {}]   ;;  %s5794_s22 = inlined_call_operand.vmem [shape: f32[2,1,1], index: 22, kind: output, shape index: {}]  }
   0x1   :  { %5798 = sst [smem:[#allocation3_spill]] %s5772_s0  ;;  %v27_v0 = vstv %s5793_s21 }
   0x2   :  { %5799 = sst [smem:[#allocation4_spill]] %s5773_s1  ;;  %28 = vst [vmem:[#allocation2] sm:$0x1] %v27_v0 }
   0x3   :  { %5800 = sst [smem:[#allocation5_spill]] %s5774_s2 }
   0x4   :  { %5801 = sst [smem:[#allocation6_spill]] %s5775_s3 }
   0x5   :  { %5802 = sst [smem:[#allocation7_spill]] %s5776_s4 }
   0x6   :  { %5803 = sst [smem:[#allocation8_spill]] %s5777_s5 }
   0x7   :  { %5804 = sst [smem:[#allocation9_spill]] %s5778_s6 }
   0x8 LB: > { %s4062_s30 = sadd.s32 4294967295, %s4940_s29   ;;  %p4066_p0 = scmp.ge.s32.totalorder %s4940_s29, 1  ;;  %s4940_s29 = sphi %s5062_s29, %s34_s29  }
   0x9   : > { %p621_p1 = scmp.lt.s32.totalorder %s4940_s29, 3 }
   0xb   : > { %p622_p2 = pnand %p4066_p0, %p621_p1 }
   0xc   : > { %p683_p3 = scmp.lt.s32.totalorder (!%p622_p2), %s4062_s30, 1  ;;  %vm697_vm0 = vcmask (!%p622_p2), 261120   ;;  %s5805_s23 = sld [smem:[#allocation3_spill]] (!%p622_p2)  ;;  %v4942_v10 = vmov (!%p622_p2), 0.0   ;;  %vm4943_vm1 = vmmov (!%p622_p2), 0   ;;  %v4841_v32 = vld [vmem:[%s5780_s8] sm:$0xff] (!%p622_p2)  }
   0xd   : > { %625 = sbr.rel (%p622_p2) target bundleno = 5101 (0x13ed), region = 108  ;;  %s5806_s6 = sld [smem:[#allocation7_spill]] (!%p622_p2)  ;;  %4442 = vmatprep.subr.bf16.mxu1 (!%p622_p2), %v4942_v10  ;;  %4458 = vmatprep.subr.bf16.mxu0 (!%p622_p2), %v4942_v10  ;;  %v4843_v34 = vld [vmem:[%s5780_s8 + $0x8] sm:$0xff] (!%p622_p2)   ;;  %v4845_v36 = vld [vmem:[%s5780_s8 + $0x20] sm:$0xff] (!%p622_p2)   ;;  %v4848_v39 = vld [vmem:[%s5780_s8 + $0x10] sm:$0xff] (!%p622_p2)   ;;  %vm1499_vm2 = vcmask (!%p622_p2), 64512  }
   0xe   : > { %4446 = vmatprep.mubr.msk.bf16.mxu1 (!%p622_p2), %vm4943_vm1, %v4942_v10  ;;  %4462 = vmatprep.mubr.msk.bf16.mxu0 (!%p622_p2), %vm4943_vm1, %v4942_v10  ;;  %s5807_s0 = sld [smem:[#allocation5_spill]] (!%p622_p2)  ;;  %s5808_s5 = sld [smem:[#allocation6_spill]] (!%p622_p2)  ;;  %v4847_v38 = vld [vmem:[%s5780_s8 + $0x28] sm:$0xff] (!%p622_p2)   ;;  %v4849_v40 = vld [vmem:[%s5780_s8 + $0x18] sm:$0xff] (!%p622_p2)   ;;  %v4850_v41 = vld [vmem:[%s5780_s8 + $0x30] sm:$0xff] (!%p622_p2)   ;;  %vm1749_vm3 = vcmask (!%p622_p2), 1043456  }
   0xf   : > { %s5809_s27 = sld [smem:[#allocation9_spill]] (!%p622_p2)  ;;  %v4851_v42 = vld [vmem:[%s5780_s8 + $0x38] sm:$0xff] (!%p622_p2)   ;;  %v4086_v51 = vld [vmem:[%s5779_s7] ss:$0 sm:$0xff] (!%p622_p2)  ;;  %v4088_v0 = vld [vmem:[%s5779_s7 + $0x2] ss:$0 sm:$0xff] (!%p622_p2) }
  0x10   : > { %s5811_s3 = sld [smem:[#allocation4_spill]] (!%p622_p2)  ;;  %vm2284_vm4 = vcmask (!%p622_p2), 523264   ;;  %vm3998_vm5 = vcmask (!%p622_p2), 253952   ;;  %vm4004_vm6 = vcmask (!%p622_p2), 0  }
  0x13   : > { %v4828_v8 = vld [vmem:[%s5806_s6] sm:$0xff] (!%p622_p2)   ;;  %v4830_v11 = vld [vmem:[%s5806_s6 + $0x8] sm:$0xff] (!%p622_p2)   ;;  %v4832_v22 = vld [vmem:[%s5806_s6 + $0x10] sm:$0xff] (!%p622_p2)  }
  0x14   : > { %s5813_s30 = smov (!%p683_p3, %s4062_s30), 1  ;;  %v4829_v9 = vld [vmem:[%s5806_s6 + $0x20] sm:$0xff]   ;;  %4443 = vmatpush3.bf16.msra.mxu1 %v4828_v8  ;;  %v4831_v12 = vld [vmem:[%s5806_s6 + $0x28] sm:$0xff]   ;;  %v4834_v25 = vld [vmem:[%s5806_s6 + $0x18] sm:$0xff]  }
  0x15   : > { %s4067_s21 = sshll.u32 %s5813_s30, 3  ;;  %4459 = vmatpush3.bf16.msra.mxu0 %v4829_v9  ;;  %4444 = vmatprep.subr.bf16.mxu1 %v4942_v10  ;;  %v4068_v17 = vld [vmem:[%s5807_s0] ss:$0 sm:$0xff]  ;;  %v4835_v26 = vld [vmem:[%s5809_s27 + $0x8] sm:$0xff]   ;;  %v4836_v27 = vld [vmem:[%s5806_s6 + $0x30] sm:$0xff]   ;;  %s5810_s0 = sld [smem:[#allocation8_spill]] }
  0x16   : > { %s686_s1 = scalar_lea.vmem %s5805_s23, %s4067_s21  ;;  %4460 = vmatprep.subr.bf16.mxu0 %v4942_v10  ;;  %v4069_v19 = vld [vmem:[%s5808_s5] ss:$0 sm:$0xff]  ;;  %v4838_v29 = vld [vmem:[%s5806_s6 + $0x38] sm:$0xff]   ;;  %v4839_v30 = vld [vmem:[%s5809_s27 + $0x28] sm:$0xff]   ;;  %s689_s28 = scalar_lea.vmem %s5811_s3, %s5813_s30 }
  0x17   : > { %v694_v1 = vld [vmem:[%s686_s1] sm:$0xff]  ;;  %v4840_v31 = vld [vmem:[%s5809_s27 + $0x10] sm:$0xff]   ;;  %v4842_v33 = vld [vmem:[%s5809_s27 + $0x18] sm:$0xff]   ;;  %s692_s24 = scalar_lea.vmem %s5794_s22, %s5813_s30 }
  0x18   : > { %v698_v2 = vsel %vm697_vm0, %v694_v1, 0.0  ;;  %4445 = vmatpush3.bf16.msra.mxu1 %v4830_v11  ;;  %v4833_v23 = vld [vmem:[%s5809_s27] sm:$0xff]   ;;  %v4844_v35 = vld [vmem:[%s5809_s27 + $0x30] sm:$0xff]   ;;  %v4846_v37 = vld [vmem:[%s5809_s27 + $0x38] sm:$0xff]  }
  0x19   : > { %699 = vadd.xlane.f32.xlu0 %v698_v2  ;;  %4461 = vmatpush3.bf16.msra.mxu0 %v4831_v12  ;;  %v4837_v28 = vld [vmem:[%s5809_s27 + $0x20] sm:$0xff]  }
  0x1a   : > { %4450 = vmatprep.subr.bf16.mxu1 %v4942_v10  ;;  %4474 = vmatprep.subr.bf16.mxu0 %v4942_v10 }
  0x1b   : > { %v4070_v62 = vld [vmem:[%s5810_s0] ss:$0 sm:$0xff] }
  0xa6   : > { %v700_v3 = vpop.xlane.xlu0 %699 }
  0xa7   : > { %v702_v4 = vmul.f32 0.03125, %v700_v3 }
  0xa9   : > { %v703_v5 = vsub.f32 %v694_v1, %v702_v4 }
  0xab   : > { %v704_v6 = vmul.f32 %v703_v5, %v703_v5 }
  0xad   : > { %v705_v7 = vsel %vm697_vm0, %v704_v6, 0.0 }
  0xae   : > { %706 = vadd.xlane.f32.xlu0 %v705_v7 }
 0x13b   : > { %v707_v13 = vpop.xlane.xlu0 %706 }
 0x13c   : > { %v708_v14 = vmul.f32 0.03125, %v707_v13 }
 0x13e   : > { %v709_v15 = vadd.f32 1e-12, %v708_v14  ;;  %v4072_v14 = vld [vmem:[%s5810_s0 + $0x2] ss:$0 sm:$0xff] }
 0x140   : > { %4888 = vrsqrt.f32 %v709_v15 }
 0x14a   : > { %v4889_v16 = vpop.eup %4888 }
 0x14b   : > { %v711_v18 = vmul.f32 %v4889_v16, %v703_v5  ;;  %v4087_v16 = vld [vmem:[%s5779_s7 + $0x1] ss:$0 sm:$0xff] }
 0x14d   : > { %v718_v20 = vmul.f32 %v4068_v17, %v711_v18  ;;  %v4102_v17 = vld [vmem:[%s5781_s9] ss:$0 sm:$0xff] }
 0x14f   : > { %v5106_v21 = vadd.f32 %v4069_v19, %v718_v20 }
 0x151   : > { %v5116_v24 = vpack.c.bf16 %v5106_v21, %v5106_v21 }
 0x153   : > { %4447 = vmatmul.mubr.msk.bf16.vlgmr.msra.gmra.mrb[0].mxu1 %vm697_vm0, %v5116_v24  ;;  %4463 = vmatmul.mubr.msk.bf16.vlgmr.msra.gmra.mrb[0].mxu0 %vm697_vm0, %v5116_v24 }
 0x154   : > { %4451 = vmatpush3.bf16.msra.mxu1 %v4832_v22  ;;  %4475 = vmatpush3.bf16.msra.mxu0 %v4833_v23 }
 0x155   : > { %4452 = vmatprep.subr.bf16.mxu1 %v4942_v10  ;;  %4476 = vmatprep.subr.bf16.mxu0 %v4942_v10 }
 0x156   : > { %4454 = vmatprep.mubr.msk.bf16.mxu1 %vm4943_vm1, %v4942_v10  ;;  %4478 = vmatprep.mubr.msk.bf16.mxu0 %vm4943_vm1, %v4942_v10 }
 0x158   : > { %4453 = vmatpush3.bf16.msra.mxu1 %v4834_v25  ;;  %4477 = vmatpush3.bf16.msra.mxu0 %v4835_v26 }
 0x159   : > { %4466 = vmatprep.subr.bf16.mxu1 %v4942_v10  ;;  %4490 = vmatprep.subr.bf16.mxu0 %v4942_v10 }
 0x15b   : > { %4455 = vmatmul.mubr.msk.bf16.vlgmr.msra.gmra.mrb[4].mxu1 %vm697_vm0, %v5116_v24  ;;  %4479 = vmatmul.mubr.msk.bf16.vlgmr.msra.gmra.mrb[4].mxu0 %vm697_vm0, %v5116_v24 }
 0x15c   : > { %4467 = vmatpush3.bf16.msra.mxu1 %v4836_v27  ;;  %4491 = vmatpush3.bf16.msra.mxu0 %v4837_v28 }
 0x15d   : > { %4468 = vmatprep.subr.bf16.mxu1 %v4942_v10  ;;  %4492 = vmatprep.subr.bf16.mxu0 %v4942_v10 }
 0x15e   : > { %4470 = vmatprep.mubr.msk.bf16.mxu1 %vm4943_vm1, %v4942_v10  ;;  %4494 = vmatprep.mubr.msk.bf16.mxu0 %vm4943_vm1, %v4942_v10 }
 0x160   : > { %4469 = vmatpush3.bf16.msra.mxu1 %v4838_v29  ;;  %4493 = vmatpush3.bf16.msra.mxu0 %v4839_v30 }
 0x161   : > { %4482 = vmatprep.subr.bf16.mxu1 %v4942_v10  ;;  %4506 = vmatprep.subr.bf16.mxu0 %v4942_v10 }
 0x163   : > { %4471 = vmatmul.mubr.msk.bf16.vlgmr.msra.gmra.mrb[8].mxu1 %vm697_vm0, %v5116_v24  ;;  %4495 = vmatmul.mubr.msk.bf16.vlgmr.msra.gmra.mrb[8].mxu0 %vm697_vm0, %v5116_v24 }
 0x164   : > { %4483 = vmatpush3.bf16.msra.mxu1 %v4840_v31  ;;  %4507 = vmatpush3.bf16.msra.mxu0 %v4841_v32 }
 0x165   : > { %4484 = vmatprep.subr.bf16.mxu1 %v4942_v10  ;;  %4508 = vmatprep.subr.bf16.mxu0 %v4942_v10 }
 0x166   : > { %4486 = vmatprep.mubr.msk.bf16.mxu1 %vm4943_vm1, %v4942_v10  ;;  %4510 = vmatprep.mubr.msk.bf16.mxu0 %vm4943_vm1, %v4942_v10 }
 0x168   : > { %4485 = vmatpush3.bf16.msra.mxu1 %v4842_v33  ;;  %4509 = vmatpush3.bf16.msra.mxu0 %v4843_v34  ;;  %v4071_v33 = vld [vmem:[%s5810_s0 + $0x1] ss:$0 sm:$0xff] }
 0x169   : > { %4498 = vmatprep.subr.bf16.mxu1 %v4942_v10  ;;  %4522 = vmatprep.subr.bf16.mxu0 %v4942_v10 }
 0x16b   : > { %4487 = vmatmul.mubr.msk.bf16.vlgmr.msra.gmra.mrb[12].mxu1 %vm697_vm0, %v5116_v24  ;;  %4511 = vmatmul.mubr.msk.bf16.vlgmr.msra.gmra.mrb[12].mxu0 %vm697_vm0, %v5116_v24 }
 0x16c   : > { %4499 = vmatpush3.bf16.msra.mxu1 %v4844_v35  ;;  %4523 = vmatpush3.bf16.msra.mxu0 %v4845_v36  ;;  %v4089_v36 = vld [vmem:[%s5779_s7 + $0x3] ss:$0 sm:$0xff] }
 0x16d   : > { %4500 = vmatprep.subr.bf16.mxu1 %v4942_v10  ;;  %4524 = vmatprep.subr.bf16.mxu0 %v4942_v10 }
 0x16e   : > { %4502 = vmatprep.mubr.msk.bf16.mxu1 %vm4943_vm1, %v4942_v10  ;;  %4526 = vmatprep.mubr.msk.bf16.mxu0 %vm4943_vm1, %v4942_v10 }
 0x170   : > { %4501 = vmatpush3.bf16.msra.mxu1 %v4846_v37  ;;  %4525 = vmatpush3.bf16.msra.mxu0 %v4847_v38 }
 0x171   : > { %4514 = vmatprep.subr.bf16.mxu1 %v4942_v10  ;;  %4538 = vmatprep.subr.bf16.mxu0 %v4942_v10 }
 0x173   : > { %4503 = vmatmul.mubr.msk.bf16.vlgmr.msra.gmra.mrb[16].mxu1 %vm697_vm0, %v5116_v24  ;;  %4527 = vmatmul.mubr.msk.bf16.vlgmr.msra.gmra.mrb[16].mxu0 %vm697_vm0, %v5116_v24 }
 0x174   : > { %4515 = vmatpush3.bf16.msra.mxu1 %v4848_v39  ;;  %4518 = vmatprep.mubr.msk.bf16.mxu1 %vm4943_vm1, %v4942_v10 }
 0x175   : > { %4516 = vmatprep.subr.bf16.mxu1 %v4942_v10  ;;  %4540 = vmatprep.mubr.msk.bf16.mxu0 %vm4943_vm1, %v4942_v10 }
 0x178   : > { %4517 = vmatpush3.bf16.msra.mxu1 %v4849_v40 }
 0x179   : > { %4530 = vmatprep.subr.bf16.mxu1 %v4942_v10 }
 0x17b   : > { %4519 = vmatmul.mubr.msk.bf16.vlgmr.msra.gmra.mrb[20].mxu1 %vm697_vm0, %v5116_v24 }
 0x17c   : > { %4531 = vmatpush3.bf16.msra.mxu1 %v4850_v41  ;;  %4534 = vmatprep.mubr.msk.bf16.mxu1 %vm4943_vm1, %v4942_v10 }
 0x17d   : > { %4532 = vmatprep.subr.bf16.mxu1 %v4942_v10 }
 0x180   : > { %4533 = vmatpush3.bf16.msra.mxu1 %v4851_v42 }
 0x181   : > { %4544 = vmatprep.subr.bf16.mxu1 %v4942_v10 }
 0x183   : > { %4535 = vmatmul.mubr.msk.bf16.vlgmr.msra.gmra.mrb[24].mxu1 %vm697_vm0, %v5116_v24 }
 0x184   : > { %4546 = vmatprep.mubr.msk.bf16.mxu1 %vm4943_vm1, %v4942_v10 }
 0x226   : > { %v821_v43 = vpop.f32.mrb[0].mxu1  ;;  %v925_v44 = vpop.f32.mrb[0].mxu0 }
 0x227   : > { %v4448_v45 = vpop.f32.mrb[1].mxu1  ;;  %v4464_v46 = vpop.f32.mrb[1].mxu0  ;;  %v822_v1 = vadd.f32 %v4070_v62, %v821_v43  ;;  %v926_v18 = vadd.f32 %v4072_v14, %v925_v44 }
 0x228   : > { %v824_v47 = vpop.f32.mrb[2].mxu1  ;;  %v928_v48 = vpop.f32.mrb[2].mxu0 }
 0x229   : > { %v4449_v49 = vpop.f32.mrb[3].mxu1  ;;  %v4465_v50 = vpop.f32.mrb[3].mxu0  ;;  %v983_v9 = vpack.c.bf16 %v822_v1, %v822_v1  ;;  %v985_v28 = vpack.c.bf16 %v926_v18, %v926_v18  ;;  %v5302_v1 = vld [vmem:[%s689_s28] ss:$0 sm:$0xff] }
 0x22a   : > { %v4073_v49 = vld [vmem:[%s5810_s0 + $0x3] ss:$0 sm:$0xff] }
 0x22e   : > { %v873_v52 = vpop.f32.mrb[4].mxu1  ;;  %v1077_v53 = vpop.f32.mrb[4].mxu0 }
 0x22f   : > { %v1078_v54 = vadd.f32 %v4086_v51, %v1077_v53  ;;  %v4456_v55 = vpop.f32.mrb[5].mxu1  ;;  %v4480_v56 = vpop.f32.mrb[5].mxu0  ;;  %v874_v37 = vadd.f32 %v4071_v33, %v873_v52  ;;  %v4103_v51 = vld [vmem:[%s5781_s9 + $0x1] ss:$0 sm:$0xff] }
 0x230   : > { %v876_v57 = vpop.f32.mrb[6].mxu1  ;;  %v1080_v58 = vpop.f32.mrb[6].mxu0 }
 0x231   : > { %v1239_v59 = vpack.c.bf16 %v1078_v54, %v1078_v54  ;;  %v4457_v60 = vpop.f32.mrb[7].mxu1  ;;  %v4481_v61 = vpop.f32.mrb[7].mxu0  ;;  %v984_v45 = vpack.c.bf16 %v874_v37, %v874_v37 }
 0x233   : > { %v1504_v63 = vsel %vm1499_vm2, %v1239_v59, 0 }
 0x234   : > { %4539 = vmatpush3.bf16.xpose.msra.mxu0 %v1504_v63 }
 0x235   : > { %4550 = vmatprep.subr.bf16.mxu0 %v4942_v10 }
 0x236   : > { %v977_v2 = vpop.f32.mrb[8].mxu1  ;;  %v1181_v3 = vpop.f32.mrb[8].mxu0 }
 0x237   : > { %v1182_v4 = vadd.f32 %v4088_v0, %v1181_v3  ;;  %v4472_v5 = vpop.f32.mrb[9].mxu1  ;;  %v4496_v6 = vpop.f32.mrb[9].mxu0  ;;  %v978_v52 = vadd.f32 %v4073_v49, %v977_v2 }
 0x238   : > { %v980_v7 = vpop.f32.mrb[10].mxu1  ;;  %v1184_v8 = vpop.f32.mrb[10].mxu0 }
 0x239   : > { %v1241_v11 = vpack.c.bf16 %v1182_v4, %v1182_v4  ;;  %v4473_v12 = vpop.f32.mrb[11].mxu1  ;;  %v4497_v13 = vpop.f32.mrb[11].mxu0  ;;  %v986_v57 = vpack.c.bf16 %v978_v52, %v978_v52 }
 0x23b   : > { %v1596_v15 = vsel %vm1499_vm2, %v1241_v11, 0  ;;  %4541 = vmatmul.mubr.msk.bf16.vlgmr.msra.gmra.mrb[20].mxu0 %vm1499_vm2, %v983_v9 }
 0x23c   : > { %4551 = vmatpush3.bf16.xpose.msra.mxu0 %v1596_v15  ;;  %4552 = vmatprep.mubr.msk.bf16.mxu0 %vm4943_vm1, %v4942_v10 }
 0x23d   : > { %4562 = vmatprep.subr.bf16.mxu0 %v4942_v10 }
 0x23e   : > { %v1129_v19 = vpop.f32.mrb[12].mxu1  ;;  %v1333_v20 = vpop.f32.mrb[12].mxu0 }
 0x23f   : > { %v1130_v22 = vadd.f32 %v4087_v16, %v1129_v19  ;;  %v1334_v23 = vadd.f32 %v4102_v17, %v1333_v20  ;;  %v4488_v24 = vpop.f32.mrb[13].mxu1  ;;  %v4512_v25 = vpop.f32.mrb[13].mxu0 }
 0x240   : > { %v1132_v26 = vpop.f32.mrb[14].mxu1  ;;  %v1336_v27 = vpop.f32.mrb[14].mxu0 }
 0x241   : > { %v1240_v29 = vpack.c.bf16 %v1130_v22, %v1130_v22  ;;  %v1495_v30 = vpack.c.bf16 %v1334_v23, %v1334_v23  ;;  %v4489_v31 = vpop.f32.mrb[15].mxu1  ;;  %v4513_v32 = vpop.f32.mrb[15].mxu0 }
 0x243   : > { %v1550_v34 = vsel %vm1499_vm2, %v1240_v29, 0  ;;  %v1751_v35 = vsel %vm1749_vm3, %v1495_v30, 0  ;;  %4553 = vmatmul.mubr.msk.bf16.vlgmr.msra.gmra.mrb[24].mxu0 %vm1499_vm2, %v985_v28 }
 0x244   : > { %4545 = vmatpush3.bf16.xpose.msra.mxu1 %v1550_v34  ;;  %4563 = vmatpush3.bf16.msra.mxu0 %v1751_v35 }
 0x245   : > { %4556 = vmatprep.subr.bf16.mxu1 %v4942_v10  ;;  %4564 = vmatprep.mubr.msk.bf16.mxu0 %vm4943_vm1, %v4942_v10 }
 0x246   : > { %v1233_v38 = vpop.f32.mrb[16].mxu1  ;;  %v5277_v39 = vpop.f32.mrb[16].mxu0  ;;  %4574 = vmatprep.subr.bf16.mxu0 %v4942_v10 }
 0x247   : > { %v1234_v40 = vadd.f32 %v4089_v36, %v1233_v38  ;;  %v4504_v41 = vpop.f32.mrb[17].mxu1  ;;  %v4528_v42 = vpop.f32.mrb[17].mxu0 }
 0x248   : > { %v1236_v43 = vpop.f32.mrb[18].mxu1  ;;  %v1440_v44 = vpop.f32.mrb[18].mxu0 }
 0x249   : > { %v1242_v46 = vpack.c.bf16 %v1234_v40, %v1234_v40  ;;  %v4505_v47 = vpop.f32.mrb[19].mxu1  ;;  %v4529_v48 = vpop.f32.mrb[19].mxu0 }
 0x24b   : > { %v1642_v50 = vsel %vm1499_vm2, %v1242_v46, 0  ;;  %4547 = vmatmul.mubr.msk.bf16.vlgmr.msra.gmra.mrb[28].mxu1 %vm1499_vm2, %v984_v45 }
 0x24c   : > { %4557 = vmatpush3.bf16.xpose.msra.mxu1 %v1642_v50  ;;  %4558 = vmatprep.mubr.msk.bf16.mxu1 %vm4943_vm1, %v4942_v10 }
 0x24d   : > { %4568 = vmatprep.subr.bf16.mxu1 %v4942_v10 }
 0x24e   : > { %v1385_v53 = vpop.f32.mrb[20].mxu1 }
 0x24f   : > { %v1386_v54 = vadd.f32 %v4103_v51, %v1385_v53  ;;  %v4520_v55 = vpop.f32.mrb[21].mxu1 }
 0x250   : > { %v1388_v56 = vpop.f32.mrb[22].mxu1 }
 0x251   : > { %v1496_v58 = vpack.c.bf16 %v1386_v54, %v1386_v54  ;;  %v4521_v59 = vpop.f32.mrb[23].mxu1  ;;  %v4104_v54 = vld [vmem:[%s5781_s9 + $0x2] ss:$0 sm:$0xff] }
 0x252   : > { %v1438_v55 = vadd.f32 %v4104_v54, %v5277_v39 }
 0x253   : > { %v1797_v60 = vsel %vm1749_vm3, %v1496_v58, 0  ;;  %4559 = vmatmul.mubr.msk.bf16.vlgmr.msra.gmra.mrb[32].mxu1 %vm1499_vm2, %v986_v57 }
 0x254   : > { %4569 = vmatpush3.bf16.msra.mxu1 %v1797_v60  ;;  %4570 = vmatprep.mubr.msk.bf16.mxu1 %vm4943_vm1, %v4942_v10  ;;  %v1497_v58 = vpack.c.bf16 %v1438_v55, %v1438_v55 }
 0x255   : > { %4580 = vmatprep.subr.bf16.mxu1 %v4942_v10 }
 0x256   : > { %v5296_v61 = vpop.f32.mrb[24].mxu1 }
 0x257   : > { %v4536_v62 = vpop.f32.mrb[25].mxu1 }
 0x258   : > { %v1492_v63 = vpop.f32.mrb[26].mxu1  ;;  %v1843_v62 = vsel %vm1749_vm3, %v1497_v58, 0 }
 0x259   : > { %v4537_v0 = vpop.f32.mrb[27].mxu1 }
 0x30e   : > { %v1540_v2 = vpop.f32.mrb[20].mxu0 }
 0x30f   : > { %v1684_v3 = vmul.f32 0.35355338, %v1540_v2  ;;  %v4542_v4 = vpop.f32.mrb[21].mxu0  ;;  %v4105_v2 = vld [vmem:[%s5781_s9 + $0x3] ss:$0 sm:$0xff] }
 0x310   : > { %v1543_v5 = vpop.f32.mrb[22].mxu0  ;;  %v1490_v4 = vadd.f32 %v4105_v2, %v5296_v61 }
 0x311   : > { %v4543_v6 = vpop.f32.mrb[23].mxu0  ;;  %v1694_v7 = vadd.f32 %v5302_v1, %v1684_v3 }
 0x313   : > { %v1698_v8 = vsel %vm1499_vm2, %v1694_v7, -inf }
 0x314   : > { %1699 = vmax.xlane.f32.xlu1 %v1698_v8 }
 0x316   : > { %v1632_v9 = vpop.f32.mrb[24].mxu0 }
 0x317   : > { %v1686_v11 = vmul.f32 0.35355338, %v1632_v9  ;;  %v4554_v12 = vpop.f32.mrb[25].mxu0 }
 0x318   : > { %v1635_v13 = vpop.f32.mrb[26].mxu0 }
 0x319   : > { %v4555_v14 = vpop.f32.mrb[27].mxu0  ;;  %v1696_v15 = vadd.f32 %v5302_v1, %v1686_v11 }
 0x31a   : > { %v1935_v14 = vld [vmem:[%s5782_s10] sm:$0xf] }
 0x31b   : > { %v1704_v16 = vsel %vm1499_vm2, %v1696_v15, -inf }
 0x31c   : > { %1705 = vmax.xlane.f32.xlu0 %v1704_v16  ;;  %v1936_v16 = vld [vmem:[%s5782_s10 + $0x4] sm:$0xf] }
 0x31e   : > { %v1586_v17 = vpop.f32.mrb[28].mxu1 }
 0x31f   : > { %v1685_v18 = vmul.f32 0.35355338, %v1586_v17  ;;  %v4548_v19 = vpop.f32.mrb[29].mxu1  ;;  %v1989_v17 = vsel %vm1749_vm3, %v1936_v16, 0 }
 0x320   : > { %v1589_v20 = vpop.f32.mrb[30].mxu1 }
 0x321   : > { %v4549_v22 = vpop.f32.mrb[31].mxu1  ;;  %v1695_v23 = vadd.f32 %v5302_v1, %v1685_v18  ;;  %v1937_v18 = vld [vmem:[%s5782_s10 + $0x8] sm:$0xf] }
 0x323   : > { %v1701_v24 = vsel %vm1499_vm2, %v1695_v23, -inf }
 0x324   : > { %1702 = vmax.xlane.f32.xlu1 %v1701_v24 }
 0x326   : > { %v1678_v25 = vpop.f32.mrb[32].mxu1 }
 0x327   : > { %v1687_v26 = vmul.f32 0.35355338, %v1678_v25  ;;  %v4560_v27 = vpop.f32.mrb[33].mxu1 }
 0x328   : > { %v1681_v28 = vpop.f32.mrb[34].mxu1 }
 0x329   : > { %v4561_v29 = vpop.f32.mrb[35].mxu1  ;;  %v1697_v30 = vadd.f32 %v5302_v1, %v1687_v26 }
 0x32b   : > { %v1707_v31 = vsel %vm1499_vm2, %v1697_v30, -inf }
 0x32c   : > { %1708 = vmax.xlane.f32.xlu1 %v1707_v31  ;;  %v1938_v31 = vld [vmem:[%s5782_s10 + $0xc] sm:$0xf] }
 0x3a1   : > { %v1700_v32 = vpop.xlane.xlu1 %1699 }
 0x3a2   : > { %v1710_v33 = vsub.f32 %v1694_v7, %v1700_v32  ;;  %v1498_v7 = vpack.c.bf16 %v1490_v4, %v1490_v4 }
 0x3a4   : > { %v1714_v34 = vmul.f32 1.442695, %v1710_v33  ;;  %v1889_v11 = vsel %vm1749_vm3, %v1498_v7, 0 }
 0x3a6   : > { %4890 = vpow2.f32 %v1714_v34 }
 0x3a9   : > { %v1706_v35 = vpop.xlane.xlu0 %1705 }
 0x3aa   : > { %v1712_v36 = vsub.f32 %v1696_v15, %v1706_v35  ;;  %v1943_v15 = vsel %vm1749_vm3, %v1935_v14, 0  ;;  %v2081_v35 = vsel %vm1749_vm3, %v1938_v31, 0  ;;  %v4853_v14 = vld [vmem:[%s5786_s14 + $0x8] sm:$0xff]  }
 0x3ac   : > { %v1718_v37 = vmul.f32 1.442695, %v1712_v36 }
 0x3ae   : > { %4892 = vpow2.f32 %v1718_v37 }
 0x3b0   : > { %v4891_v38 = vpop.eup %4890 }
 0x3b1   : > { %v1703_v40 = vpop.xlane.xlu1 %1702  ;;  %v1722_v41 = vsel %vm1499_vm2, %v4891_v38, 0.0 }
 0x3b2   : > { %v1711_v42 = vsub.f32 %v1695_v23, %v1703_v40  ;;  %1723 = vadd.xlane.f32.xlu0 %v1722_v41  ;;  %v2035_v23 = vsel %vm1749_vm3, %v1937_v18, 0  ;;  %v4132_v18 = vld [vmem:[%s5784_s12] ss:$0 sm:$0xff] }
 0x3b4   : > { %v1716_v43 = vmul.f32 1.442695, %v1711_v42 }
 0x3b6   : > { %4894 = vpow2.f32 %v1716_v43 }
 0x3b8   : > { %v4893_v44 = vpop.eup %4892 }
 0x3b9   : > { %v1709_v45 = vpop.xlane.xlu1 %1708  ;;  %v1728_v46 = vsel %vm1499_vm2, %v4893_v44, 0.0 }
 0x3ba   : > { %v1713_v47 = vsub.f32 %v1697_v30, %v1709_v45  ;;  %1729 = vadd.xlane.f32.xlu0 %v1728_v46 }
 0x3bc   : > { %v1720_v48 = vmul.f32 1.442695, %v1713_v47 }
 0x3be   : > { %4896 = vpow2.f32 %v1720_v48 }
 0x3c0   : > { %v4895_v49 = vpop.eup %4894 }
 0x3c1   : > { %v1725_v50 = vsel %vm1499_vm2, %v4895_v49, 0.0 }
 0x3c2   : > { %1726 = vadd.xlane.f32.xlu1 %v1725_v50 }
 0x3c8   : > { %v4897_v51 = vpop.eup %4896 }
 0x3c9   : > { %v1731_v52 = vsel %vm1499_vm2, %v4897_v51, 0.0 }
 0x3ca   : > { %1732 = vadd.xlane.f32.xlu1 %v1731_v52 }
 0x43f   : > { %v1724_v53 = vpop.xlane.xlu0 %1723 }
 0x440   : > { %4898 = vrcp.f32 %v1724_v53 }
 0x447   : > { %v1730_v56 = vpop.xlane.xlu0 %1729 }
 0x448   : > { %4900 = vrcp.f32 %v1730_v56 }
 0x44a   : > { %v4899_v57 = vpop.eup %4898 }
 0x44b   : > { %v1738_v59 = vmul.f32 %v4899_v57, %v4891_v38 }
 0x44d   : > { %v1742_v60 = vpack.c.bf16 %v1738_v59, %v1738_v59 }
 0x44f   : > { %4565 = vmatmul.mubr.msk.bf16.vlgmr.msra.gmra.mrb[28].mxu0 %vm1499_vm2, %v1742_v60  ;;  %v1727_v63 = vpop.xlane.xlu1 %1726 }
 0x450   : > { %4575 = vmatpush3.bf16.msra.mxu0 %v1843_v62  ;;  %4902 = vrcp.f32 %v1727_v63  ;;  %4576 = vmatprep.mubr.msk.bf16.mxu0 %vm4943_vm1, %v4942_v10 }
 0x451   : > { %4586 = vmatprep.subr.bf16.mxu0 %v4942_v10 }
 0x452   : > { %v4901_v0 = vpop.eup %4900 }
 0x453   : > { %v1740_v39 = vmul.f32 %v4901_v0, %v4893_v44  ;;  %v4131_v0 = vld [vmem:[%s5783_s11] ss:$0 sm:$0xff] }
 0x455   : > { %v1744_v3 = vpack.c.bf16 %v1740_v39, %v1740_v39 }
 0x457   : > { %4577 = vmatmul.mubr.msk.bf16.vlgmr.msra.gmra.mrb[32].mxu0 %vm1499_vm2, %v1744_v3  ;;  %v1733_v5 = vpop.xlane.xlu1 %1732 }
 0x458   : > { %4904 = vrcp.f32 %v1733_v5  ;;  %4588 = vmatprep.mubr.msk.bf16.mxu0 %vm4943_vm1, %v4942_v10  ;;  %4587 = vmatpush3.bf16.msra.mxu0 %v1943_v15 }
 0x459   : > { %4598 = vmatprep.subr.bf16.mxu0 %v4942_v10 }
 0x45a   : > { %v4903_v6 = vpop.eup %4902 }
 0x45b   : > { %v1739_v8 = vmul.f32 %v4903_v6, %v4895_v49 }
 0x45d   : > { %v1743_v9 = vpack.c.bf16 %v1739_v8, %v1739_v8 }
 0x45f   : > { %4571 = vmatmul.mubr.msk.bf16.vlgmr.msra.gmra.mrb[36].mxu1 %vm1499_vm2, %v1743_v9 }
 0x460   : > { %4581 = vmatpush3.bf16.msra.mxu1 %v1889_v11  ;;  %4582 = vmatprep.mubr.msk.bf16.mxu1 %vm4943_vm1, %v4942_v10 }
 0x461   : > { %4592 = vmatprep.subr.bf16.mxu1 %v4942_v10 }
 0x462   : > { %v4905_v61 = vpop.eup %4904 }
 0x463   : > { %v1741_v12 = vmul.f32 %v4905_v61, %v4897_v51 }
 0x465   : > { %v1745_v13 = vpack.c.bf16 %v1741_v12, %v1741_v12 }
 0x467   : > { %4583 = vmatmul.mubr.msk.bf16.vlgmr.msra.gmra.mrb[40].mxu1 %vm1499_vm2, %v1745_v13  ;;  %v4852_v13 = vld [vmem:[%s5786_s14] sm:$0xff]  }
 0x468   : > { %4594 = vmatprep.mubr.msk.bf16.mxu1 %vm4943_vm1, %v4942_v10  ;;  %4593 = vmatpush3.bf16.msra.mxu1 %v1989_v17 }
 0x469   : > { %4604 = vmatprep.subr.bf16.mxu1 %v4942_v10 }
 0x522   : > { %v1787_v19 = vpop.f32.mrb[28].mxu0 }
 0x523   : > { %v1931_v20 = vpack.c.bf16 %v1787_v19, %v1787_v19  ;;  %v4566_v22 = vpop.f32.mrb[29].mxu0 }
 0x524   : > { %v1790_v24 = vpop.f32.mrb[30].mxu0 }
 0x525   : > { %v4567_v25 = vpop.f32.mrb[31].mxu0  ;;  %4589 = vmatmul.mubr.msk.bf16.vlgmr.msra.gmra.mrb[36].mxu0 %vm1499_vm2, %v1931_v20  ;;  %v4133_v20 = vld [vmem:[%s5785_s13] ss:$0 sm:$0xff] }
 0x526   : > { %4599 = vmatpush3.bf16.msra.mxu0 %v2035_v23  ;;  %4600 = vmatprep.mubr.msk.bf16.mxu0 %vm4943_vm1, %v4942_v10  ;;  %v4854_v25 = vld [vmem:[%s5788_s16] sm:$0xff]  }
 0x527   : > { %4610 = vmatprep.subr.bf16.mxu0 %v4942_v10 }
 0x52a   : > { %v1879_v26 = vpop.f32.mrb[32].mxu0 }
 0x52b   : > { %v1933_v27 = vpack.c.bf16 %v1879_v26, %v1879_v26  ;;  %v4578_v28 = vpop.f32.mrb[33].mxu0  ;;  %v4855_v26 = vld [vmem:[%s5788_s16 + $0x8] sm:$0xff]  }
 0x52c   : > { %v1882_v29 = vpop.f32.mrb[34].mxu0  ;;  %v4857_v28 = vld [vmem:[%s5788_s16 + $0x18] sm:$0xff]  }
 0x52d   : > { %v4579_v30 = vpop.f32.mrb[35].mxu0  ;;  %4601 = vmatmul.mubr.msk.bf16.vlgmr.msra.gmra.mrb[40].mxu0 %vm1499_vm2, %v1933_v27  ;;  %v4856_v27 = vld [vmem:[%s5788_s16 + $0x10] sm:$0xff]   ;;  %v4134_v29 = vld [vmem:[%s5787_s15] ss:$0 sm:$0xff] }
 0x52e   : > { %4614 = vmatprep.mubr.msk.bf16.mxu0 %vm4943_vm1, %v4942_v10  ;;  %4611 = vmatpush3.bf16.msra.mxu0 %v4852_v13  ;;  %v4865_v13 = vld [vmem:[%s5809_s27 + $0x48] sm:$0xff]  }
 0x52f   : > { %4612 = vmatprep.subr.bf16.mxu0 %v4942_v10 }
 0x532   : > { %v1833_v32 = vpop.f32.mrb[36].mxu1  ;;  %4613 = vmatpush3.bf16.msra.mxu0 %v4853_v14  ;;  %v4866_v14 = vld [vmem:[%s5806_s6 + $0x70] sm:$0xff]  }
 0x533   : > { %v1932_v33 = vpack.c.bf16 %v1833_v32, %v1833_v32  ;;  %v4572_v34 = vpop.f32.mrb[37].mxu1  ;;  %4630 = vmatprep.subr.bf16.mxu0 %v4942_v10 }
 0x534   : > { %v1836_v36 = vpop.f32.mrb[38].mxu1 }
 0x535   : > { %v4573_v37 = vpop.f32.mrb[39].mxu1  ;;  %4595 = vmatmul.mubr.msk.bf16.vlgmr.msra.gmra.mrb[44].mxu1 %vm1499_vm2, %v1932_v33 }
 0x536   : > { %4605 = vmatpush3.bf16.msra.mxu1 %v2081_v35  ;;  %4606 = vmatprep.mubr.msk.bf16.mxu1 %vm4943_vm1, %v4942_v10 }
 0x537   : > { %4618 = vmatprep.subr.bf16.mxu1 %v4942_v10 }
 0x53a   : > { %v1925_v38 = vpop.f32.mrb[40].mxu1 }
 0x53b   : > { %v1934_v40 = vpack.c.bf16 %v1925_v38, %v1925_v38  ;;  %v4584_v41 = vpop.f32.mrb[41].mxu1 }
 0x53c   : > { %v1928_v42 = vpop.f32.mrb[42].mxu1 }
 0x53d   : > { %v4585_v43 = vpop.f32.mrb[43].mxu1  ;;  %4607 = vmatmul.mubr.msk.bf16.vlgmr.msra.gmra.mrb[48].mxu1 %vm1499_vm2, %v1934_v40 }
 0x53e   : > { %4626 = vmatprep.mubr.msk.bf16.mxu1 %vm4943_vm1, %v4942_v10  ;;  %4619 = vmatpush3.bf16.msra.mxu1 %v4854_v25  ;;  %v4877_v25 = vld [vmem:[%s5780_s8 + $0x68] sm:$0xff]  }
 0x53f   : > { %4620 = vmatprep.subr.bf16.mxu1 %v4942_v10 }
 0x542   : > { %4621 = vmatpush3.bf16.msra.mxu1 %v4855_v26  ;;  %v4878_v26 = vld [vmem:[%s5780_s8 + $0x50] sm:$0xff]  }
 0x543   : > { %4622 = vmatprep.subr.bf16.mxu1 %v4942_v10 }
 0x546   : > { %4623 = vmatpush3.bf16.msra.mxu1 %v4856_v27  ;;  %v4879_v27 = vld [vmem:[%s5780_s8 + $0x58] sm:$0xff]  }
 0x547   : > { %4624 = vmatprep.subr.bf16.mxu1 %v4942_v10 }
 0x54a   : > { %4625 = vmatpush3.bf16.msra.mxu1 %v4857_v28  ;;  %v4880_v28 = vld [vmem:[%s5780_s8 + $0x70] sm:$0xff]  }
 0x54b   : > { %4646 = vmatprep.subr.bf16.mxu1 %v4942_v10 }
 0x5f8   : > { %v1979_v44 = vpop.f32.mrb[36].mxu0 }
 0x5f9   : > { %v4590_v45 = vpop.f32.mrb[37].mxu0  ;;  %v2123_v53 = vsel %vm697_vm0, %v1979_v44, 0.0 }
 0x5fa   : > { %v1982_v46 = vpop.f32.mrb[38].mxu0 }
 0x5fb   : > { %v4591_v47 = vpop.f32.mrb[39].mxu0  ;;  %v4138_v46 = vld [vmem:[%s5789_s17] ss:$0 sm:$0xff] }
 0x600   : > { %v2071_v48 = vpop.f32.mrb[40].mxu0 }
 0x601   : > { %v4602_v49 = vpop.f32.mrb[41].mxu0  ;;  %v2126_v58 = vsel %vm697_vm0, %v2071_v48, 0.0 }
 0x602   : > { %v2074_v50 = vpop.f32.mrb[42].mxu0 }
 0x603   : > { %v4603_v51 = vpop.f32.mrb[43].mxu0 }
 0x608   : > { %v2025_v52 = vpop.f32.mrb[44].mxu1 }
 0x609   : > { %v2124_v54 = vsel %vm697_vm0, %v2025_v52, 0.0  ;;  %v4596_v55 = vpop.f32.mrb[45].mxu1 }
 0x60a   : > { %v2125_v56 = vadd.f32 %v2124_v54, %v2123_v53  ;;  %v2028_v57 = vpop.f32.mrb[46].mxu1 }
 0x60b   : > { %v4597_v59 = vpop.f32.mrb[47].mxu1 }
 0x60c   : > { %v2127_v60 = vadd.f32 %v2126_v58, %v2125_v56  ;;  %v4858_v59 = vld [vmem:[%s5806_s6 + $0x40] sm:$0xff]  }
 0x610   : > { %v2117_v62 = vpop.f32.mrb[48].mxu1 }
 0x611   : > { %v2128_v63 = vsel %vm697_vm0, %v2117_v62, 0.0  ;;  %v4608_v39 = vpop.f32.mrb[49].mxu1  ;;  %v4860_v62 = vld [vmem:[%s5806_s6 + $0x48] sm:$0xff]  }
 0x612   : > { %v2129_v2 = vadd.f32 %v2128_v63, %v2127_v60  ;;  %v2120_v3 = vpop.f32.mrb[50].mxu1  ;;  %v4859_v60 = vld [vmem:[%s5806_s6 + $0x60] sm:$0xff]   ;;  %v4861_v63 = vld [vmem:[%s5806_s6 + $0x68] sm:$0xff]  }
 0x613   : > { %v4609_v4 = vpop.f32.mrb[51].mxu1 }
 0x614   : > { %v2137_v5 = vadd.f32 %v4131_v0, %v2129_v2  ;;  %v4144_v4 = vld [vmem:[%s5790_s18] ss:$0 sm:$0xff] }
 0x616   : > { %v2138_v6 = vadd.f32 %v2137_v5, %v5106_v21 }
 0x618   : > { %v2141_v7 = vsel %vm697_vm0, %v2138_v6, 0.0 }
 0x619   : > { %2142 = vadd.xlane.f32.xlu0 %v2141_v7 }
 0x6a6   : > { %v2143_v8 = vpop.xlane.xlu0 %2142 }
 0x6a7   : > { %v2144_v9 = vmul.f32 0.03125, %v2143_v8 }
 0x6a9   : > { %v2145_v11 = vsub.f32 %v2138_v6, %v2144_v9  ;;  %v4145_v6 = vld [vmem:[%s5791_s19] ss:$0 sm:$0xff]  ;;  %v4862_v9 = vld [vmem:[%s5806_s6 + $0x50] sm:$0xff]  }
 0x6ab   : > { %v2146_v61 = vmul.f32 %v2145_v11, %v2145_v11 }
 0x6ad   : > { %v2147_v12 = vsel %vm697_vm0, %v2146_v61, 0.0 }
 0x6ae   : > { %2148 = vadd.xlane.f32.xlu1 %v2147_v12  ;;  %v4864_v12 = vld [vmem:[%s5806_s6 + $0x58] sm:$0xff]  }
 0x73b   : > { %v2149_v21 = vpop.xlane.xlu1 %2148 }
 0x73c   : > { %v2150_v15 = vmul.f32 0.03125, %v2149_v21  ;;  %v4867_v21 = vld [vmem:[%s5809_s27 + $0x60] sm:$0xff]  }
 0x73e   : > { %v2151_v16 = vadd.f32 1e-12, %v2150_v15  ;;  %v4868_v15 = vld [vmem:[%s5806_s6 + $0x78] sm:$0xff]  }
 0x740   : > { %4906 = vrsqrt.f32 %v2151_v16  ;;  %v4869_v16 = vld [vmem:[%s5809_s27 + $0x68] sm:$0xff]  }
 0x74a   : > { %v4907_v17 = vpop.eup %4906 }
 0x74b   : > { %v2153_v19 = vmul.f32 %v4907_v17, %v2145_v11  ;;  %v4863_v11 = vld [vmem:[%s5809_s27 + $0x40] sm:$0xff]   ;;  %v4870_v17 = vld [vmem:[%s5809_s27 + $0x50] sm:$0xff]  }
 0x74d   : > { %v2160_v22 = vmul.f32 %v4132_v18, %v2153_v19  ;;  %v4871_v18 = vld [vmem:[%s5780_s8 + $0x40] sm:$0xff]   ;;  %v4872_v19 = vld [vmem:[%s5809_s27 + $0x58] sm:$0xff]  }
 0x74f   : > { %v2167_v23 = vadd.f32 %v4133_v20, %v2160_v22  ;;  %v4873_v20 = vld [vmem:[%s5780_s8 + $0x48] sm:$0xff]   ;;  %v4874_v22 = vld [vmem:[%s5809_s27 + $0x70] sm:$0xff]  }
 0x751   : > { %v2168_v24 = vpack.c.bf16 %v2167_v23, %v2167_v23 }
 0x753   : > { %4615 = vmatmul.mubr.msk.bf16.vlgmr.msra.gmra.mrb[44].mxu0 %vm697_vm0, %v2168_v24  ;;  %v4876_v24 = vld [vmem:[%s5809_s27 + $0x78] sm:$0xff]  }
 0x754   : > { %4634 = vmatprep.mubr.msk.bf16.mxu0 %vm4943_vm1, %v4942_v10  ;;  %4631 = vmatpush3.bf16.msra.mxu0 %v4858_v59 }
 0x755   : > { %4632 = vmatprep.subr.bf16.mxu0 %v4942_v10 }
 0x758   : > { %4633 = vmatpush3.bf16.msra.mxu0 %v4860_v62 }
 0x759   : > { %4638 = vmatprep.subr.bf16.mxu0 %v4942_v10 }
 0x826   : > { %v2229_v30 = vpop.f32.mrb[44].mxu0 }
 0x827   : > { %v2230_v31 = vadd.f32 %v4134_v29, %v2229_v30  ;;  %v4616_v32 = vpop.f32.mrb[45].mxu0  ;;  %v4881_v29 = vld [vmem:[%s5780_s8 + $0x78] sm:$0xff]  }
 0x828   : > { %v2232_v33 = vpop.f32.mrb[46].mxu0 }
 0x829   : > { %v2236_v34 = vmul.f32 0.044715, %v2230_v31  ;;  %v4617_v35 = vpop.f32.mrb[47].mxu0  ;;  %v2235_v42 = vmul.f32 0.5, %v2230_v31 }
 0x82b   : > { %v2237_v36 = vmul.f32 %v2236_v34, %v2230_v31 }
 0x82d   : > { %v2238_v37 = vmul.f32 %v2237_v36, %v2230_v31 }
 0x82f   : > { %v2239_v38 = vadd.f32 %v2238_v37, %v2230_v31 }
 0x831   : > { %v2240_v40 = vmul.f32 0.7978846, %v2239_v38  ;;  %v4202_v38 = vld [vmem:[%s5779_s7 + $0x4] ss:$0 sm:$0xff] }
 0x833   : > { %4908 = vtanh.f32 %v2240_v40 }
 0x83d   : > { %v4909_v41 = vpop.eup %4908 }
 0x83e   : > { %v2242_v43 = vadd.f32 1.0, %v4909_v41 }
 0x840   : > { %v2243_v44 = vmul.f32 %v2242_v43, %v2235_v42 }
 0x842   : > { %v2244_v45 = vpack.c.bf16 %v2243_v44, %v2243_v44 }
 0x844   : > { %4627 = vmatmul.mubr.msk.bf16.vlgmr.msra.gmra.mrb[52].mxu1 %vm2284_vm4, %v2244_v45 }
 0x845   : > { %4650 = vmatprep.mubr.msk.bf16.mxu1 %vm4943_vm1, %v4942_v10  ;;  %4647 = vmatpush3.bf16.msra.mxu1 %v4859_v60 }
 0x846   : > { %4648 = vmatprep.subr.bf16.mxu1 %v4942_v10 }
 0x849   : > { %4649 = vmatpush3.bf16.msra.mxu1 %v4861_v63 }
 0x84a   : > { %4662 = vmatprep.subr.bf16.mxu1 %v4942_v10 }
 0x917   : > { %v2322_v47 = vpop.f32.mrb[52].mxu1 }
 0x918   : > { %v2323_v48 = vadd.f32 %v4138_v46, %v2322_v47  ;;  %v4628_v49 = vpop.f32.mrb[53].mxu1 }
 0x919   : > { %v2325_v50 = vpop.f32.mrb[54].mxu1 }
 0x91a   : > { %v4629_v51 = vpop.f32.mrb[55].mxu1  ;;  %v2328_v52 = vadd.f32 %v2323_v48, %v2167_v23  ;;  %v4875_v23 = vld [vmem:[%s5780_s8 + $0x60] sm:$0xff]  }
 0x91b   : > { %v4166_v50 = vld [vmem:[%s5810_s0 + $0x4] ss:$0 sm:$0xff] }
 0x91c   : > { %v2331_v53 = vsel %vm697_vm0, %v2328_v52, 0.0 }
 0x91d   : > { %2332 = vadd.xlane.f32.xlu0 %v2331_v53 }
 0x9aa   : > { %v2333_v54 = vpop.xlane.xlu0 %2332 }
 0x9ab   : > { %v2334_v55 = vmul.f32 0.03125, %v2333_v54 }
 0x9ad   : > { %v2335_v56 = vsub.f32 %v2328_v52, %v2334_v55  ;;  %v4204_v52 = vld [vmem:[%s5779_s7 + $0x6] ss:$0 sm:$0xff] }
 0x9af   : > { %v2336_v57 = vmul.f32 %v2335_v56, %v2335_v56 }
 0x9b1   : > { %v2337_v58 = vsel %vm697_vm0, %v2336_v57, 0.0 }
 0x9b2   : > { %2338 = vadd.xlane.f32.xlu1 %v2337_v58 }
 0xa3f   : > { %v2339_v0 = vpop.xlane.xlu1 %2338 }
 0xa40   : > { %v2340_v39 = vmul.f32 0.03125, %v2339_v0 }
 0xa42   : > { %v2341_v2 = vadd.f32 1e-12, %v2340_v39 }
 0xa44   : > { %4910 = vrsqrt.f32 %v2341_v2  ;;  %v4168_v2 = vld [vmem:[%s5810_s0 + $0x6] ss:$0 sm:$0xff] }
 0xa4e   : > { %v4911_v3 = vpop.eup %4910 }
 0xa4f   : > { %v2343_v5 = vmul.f32 %v4911_v3, %v2335_v56 }
 0xa51   : > { %v2350_v7 = vmul.f32 %v4144_v4, %v2343_v5  ;;  %v4203_v4 = vld [vmem:[%s5779_s7 + $0x5] ss:$0 sm:$0xff]  ;;  %v4238_v5 = vld [vmem:[%s5781_s9 + $0x4] ss:$0 sm:$0xff] }
 0xa53   : > { %v5448_v8 = vadd.f32 %v4145_v6, %v2350_v7 }
 0xa55   : > { %v5458_v61 = vpack.c.bf16 %v5448_v8, %v5448_v8 }
 0xa57   : > { %4635 = vmatmul.mubr.msk.bf16.vlgmr.msra.gmra.mrb[48].mxu0 %vm697_vm0, %v5458_v61  ;;  %4651 = vmatmul.mubr.msk.bf16.vlgmr.msra.gmra.mrb[56].mxu1 %vm697_vm0, %v5458_v61 }
 0xa58   : > { %4639 = vmatpush3.bf16.msra.mxu0 %v4862_v9  ;;  %4663 = vmatpush3.bf16.msra.mxu1 %v4863_v11 }
 0xa59   : > { %4640 = vmatprep.subr.bf16.mxu0 %v4942_v10  ;;  %4664 = vmatprep.subr.bf16.mxu1 %v4942_v10 }
 0xa5a   : > { %4642 = vmatprep.mubr.msk.bf16.mxu0 %vm4943_vm1, %v4942_v10  ;;  %4666 = vmatprep.mubr.msk.bf16.mxu1 %vm4943_vm1, %v4942_v10 }
 0xa5c   : > { %4641 = vmatpush3.bf16.msra.mxu0 %v4864_v12  ;;  %4665 = vmatpush3.bf16.msra.mxu1 %v4865_v13 }
 0xa5d   : > { %4654 = vmatprep.subr.bf16.mxu0 %v4942_v10  ;;  %4678 = vmatprep.subr.bf16.mxu1 %v4942_v10 }
 0xa5f   : > { %4643 = vmatmul.mubr.msk.bf16.vlgmr.msra.gmra.mrb[52].mxu0 %vm697_vm0, %v5458_v61  ;;  %4667 = vmatmul.mubr.msk.bf16.vlgmr.msra.gmra.mrb[60].mxu1 %vm697_vm0, %v5458_v61 }
 0xa60   : > { %4655 = vmatpush3.bf16.msra.mxu0 %v4866_v14  ;;  %4679 = vmatpush3.bf16.msra.mxu1 %v4867_v21 }
 0xa61   : > { %4656 = vmatprep.subr.bf16.mxu0 %v4942_v10  ;;  %4680 = vmatprep.subr.bf16.mxu1 %v4942_v10 }
 0xa62   : > { %4658 = vmatprep.mubr.msk.bf16.mxu0 %vm4943_vm1, %v4942_v10  ;;  %4682 = vmatprep.mubr.msk.bf16.mxu1 %vm4943_vm1, %v4942_v10 }
 0xa64   : > { %4657 = vmatpush3.bf16.msra.mxu0 %v4868_v15  ;;  %4681 = vmatpush3.bf16.msra.mxu1 %v4869_v16 }
 0xa65   : > { %4670 = vmatprep.subr.bf16.mxu0 %v4942_v10  ;;  %4694 = vmatprep.subr.bf16.mxu1 %v4942_v10 }
 0xa67   : > { %4659 = vmatmul.mubr.msk.bf16.vlgmr.msra.gmra.mrb[56].mxu0 %vm697_vm0, %v5458_v61  ;;  %4683 = vmatmul.mubr.msk.bf16.vlgmr.msra.gmra.mrb[64].mxu1 %vm697_vm0, %v5458_v61 }
 0xa68   : > { %4671 = vmatpush3.bf16.msra.mxu0 %v4870_v17  ;;  %4695 = vmatpush3.bf16.msra.mxu1 %v4871_v18 }
 0xa69   : > { %4672 = vmatprep.subr.bf16.mxu0 %v4942_v10  ;;  %4696 = vmatprep.subr.bf16.mxu1 %v4942_v10 }
 0xa6a   : > { %4674 = vmatprep.mubr.msk.bf16.mxu0 %vm4943_vm1, %v4942_v10  ;;  %4698 = vmatprep.mubr.msk.bf16.mxu1 %vm4943_vm1, %v4942_v10 }
 0xa6c   : > { %4673 = vmatpush3.bf16.msra.mxu0 %v4872_v19  ;;  %4697 = vmatpush3.bf16.msra.mxu1 %v4873_v20  ;;  %v4167_v20 = vld [vmem:[%s5810_s0 + $0x5] ss:$0 sm:$0xff] }
 0xa6d   : > { %4686 = vmatprep.subr.bf16.mxu0 %v4942_v10  ;;  %4710 = vmatprep.subr.bf16.mxu1 %v4942_v10 }
 0xa6f   : > { %4675 = vmatmul.mubr.msk.bf16.vlgmr.msra.gmra.mrb[60].mxu0 %vm697_vm0, %v5458_v61  ;;  %4699 = vmatmul.mubr.msk.bf16.vlgmr.msra.gmra.mrb[68].mxu1 %vm697_vm0, %v5458_v61 }
 0xa70   : > { %4687 = vmatpush3.bf16.msra.mxu0 %v4874_v22  ;;  %4711 = vmatpush3.bf16.msra.mxu1 %v4875_v23 }
 0xa71   : > { %4688 = vmatprep.subr.bf16.mxu0 %v4942_v10  ;;  %4712 = vmatprep.subr.bf16.mxu1 %v4942_v10 }
 0xa72   : > { %4690 = vmatprep.mubr.msk.bf16.mxu0 %vm4943_vm1, %v4942_v10  ;;  %4714 = vmatprep.mubr.msk.bf16.mxu1 %vm4943_vm1, %v4942_v10 }
 0xa74   : > { %4689 = vmatpush3.bf16.msra.mxu0 %v4876_v24  ;;  %4713 = vmatpush3.bf16.msra.mxu1 %v4877_v25  ;;  %v4205_v24 = vld [vmem:[%s5779_s7 + $0x7] ss:$0 sm:$0xff] }
 0xa75   : > { %4702 = vmatprep.subr.bf16.mxu0 %v4942_v10  ;;  %4726 = vmatprep.subr.bf16.mxu1 %v4942_v10 }
 0xa77   : > { %4691 = vmatmul.mubr.msk.bf16.vlgmr.msra.gmra.mrb[64].mxu0 %vm697_vm0, %v5458_v61  ;;  %4715 = vmatmul.mubr.msk.bf16.vlgmr.msra.gmra.mrb[72].mxu1 %vm697_vm0, %v5458_v61 }
 0xa78   : > { %4703 = vmatpush3.bf16.msra.mxu0 %v4878_v26  ;;  %4706 = vmatprep.mubr.msk.bf16.mxu0 %vm4943_vm1, %v4942_v10 }
 0xa79   : > { %4704 = vmatprep.subr.bf16.mxu0 %v4942_v10  ;;  %4728 = vmatprep.mubr.msk.bf16.mxu1 %vm4943_vm1, %v4942_v10 }
 0xa7c   : > { %4705 = vmatpush3.bf16.msra.mxu0 %v4879_v27 }
 0xa7d   : > { %4718 = vmatprep.subr.bf16.mxu0 %v4942_v10 }
 0xa7f   : > { %4707 = vmatmul.mubr.msk.bf16.vlgmr.msra.gmra.mrb[68].mxu0 %vm697_vm0, %v5458_v61 }
 0xa80   : > { %4719 = vmatpush3.bf16.msra.mxu0 %v4880_v28  ;;  %4722 = vmatprep.mubr.msk.bf16.mxu0 %vm4943_vm1, %v4942_v10 }
 0xa81   : > { %4720 = vmatprep.subr.bf16.mxu0 %v4942_v10 }
 0xa84   : > { %4721 = vmatpush3.bf16.msra.mxu0 %v4881_v29 }
 0xa85   : > { %4732 = vmatprep.subr.bf16.mxu0 %v4942_v10 }
 0xa87   : > { %4723 = vmatmul.mubr.msk.bf16.vlgmr.msra.gmra.mrb[72].mxu0 %vm697_vm0, %v5458_v61 }
 0xa88   : > { %4734 = vmatprep.mubr.msk.bf16.mxu0 %vm4943_vm1, %v4942_v10 }
 0xb2a   : > { %v2454_v30 = vpop.f32.mrb[48].mxu0  ;;  %v2558_v31 = vpop.f32.mrb[56].mxu1 }
 0xb2b   : > { %v4636_v32 = vpop.f32.mrb[49].mxu0  ;;  %v4652_v33 = vpop.f32.mrb[57].mxu1  ;;  %v2455_v53 = vadd.f32 %v4166_v50, %v2454_v30  ;;  %v2559_v6 = vadd.f32 %v4168_v2, %v2558_v31 }
 0xb2c   : > { %v2457_v34 = vpop.f32.mrb[50].mxu0  ;;  %v2561_v35 = vpop.f32.mrb[58].mxu1 }
 0xb2d   : > { %v4637_v36 = vpop.f32.mrb[51].mxu0  ;;  %v4653_v37 = vpop.f32.mrb[59].mxu1  ;;  %v2616_v62 = vpack.c.bf16 %v2455_v53, %v2455_v53  ;;  %v2618_v15 = vpack.c.bf16 %v2559_v6, %v2559_v6 }
 0xb2e   : > { %v4169_v37 = vld [vmem:[%s5810_s0 + $0x7] ss:$0 sm:$0xff] }
 0xb32   : > { %v2506_v40 = vpop.f32.mrb[52].mxu0  ;;  %v2712_v41 = vpop.f32.mrb[60].mxu1 }
 0xb33   : > { %v2713_v42 = vadd.f32 %v4202_v38, %v2712_v41  ;;  %v4644_v43 = vpop.f32.mrb[53].mxu0  ;;  %v4668_v44 = vpop.f32.mrb[61].mxu1  ;;  %v2507_v25 = vadd.f32 %v4167_v20, %v2506_v40  ;;  %v4239_v40 = vld [vmem:[%s5781_s9 + $0x5] ss:$0 sm:$0xff] }
 0xb34   : > { %v2509_v45 = vpop.f32.mrb[54].mxu0  ;;  %v2715_v46 = vpop.f32.mrb[62].mxu1 }
 0xb35   : > { %v2874_v47 = vpack.c.bf16 %v2713_v42, %v2713_v42  ;;  %v4645_v48 = vpop.f32.mrb[55].mxu0  ;;  %v4669_v49 = vpop.f32.mrb[63].mxu1  ;;  %v2617_v33 = vpack.c.bf16 %v2507_v25, %v2507_v25 }
 0xb37   : > { %v3140_v51 = vsel %vm1499_vm2, %v2874_v47, 0 }
 0xb38   : > { %4727 = vmatpush3.bf16.xpose.msra.mxu1 %v3140_v51 }
 0xb39   : > { %4738 = vmatprep.subr.bf16.mxu1 %v4942_v10 }
 0xb3a   : > { %v2610_v54 = vpop.f32.mrb[56].mxu0  ;;  %v2816_v55 = vpop.f32.mrb[64].mxu1 }
 0xb3b   : > { %v2817_v56 = vadd.f32 %v4204_v52, %v2816_v55  ;;  %v4660_v57 = vpop.f32.mrb[57].mxu0  ;;  %v4684_v58 = vpop.f32.mrb[65].mxu1  ;;  %v2611_v41 = vadd.f32 %v4169_v37, %v2610_v54 }
 0xb3c   : > { %v2613_v59 = vpop.f32.mrb[58].mxu0  ;;  %v2819_v60 = vpop.f32.mrb[66].mxu1 }
 0xb3d   : > { %v2876_v63 = vpack.c.bf16 %v2817_v56, %v2817_v56  ;;  %v4661_v0 = vpop.f32.mrb[59].mxu0  ;;  %v4685_v39 = vpop.f32.mrb[67].mxu1  ;;  %v2619_v46 = vpack.c.bf16 %v2611_v41, %v2611_v41 }
 0xb3f   : > { %v3232_v3 = vsel %vm1499_vm2, %v2876_v63, 0  ;;  %4729 = vmatmul.mubr.msk.bf16.vlgmr.msra.gmra.mrb[76].mxu1 %vm1499_vm2, %v2616_v62 }
 0xb40   : > { %4739 = vmatpush3.bf16.xpose.msra.mxu1 %v3232_v3  ;;  %4740 = vmatprep.mubr.msk.bf16.mxu1 %vm4943_vm1, %v4942_v10 }
 0xb41   : > { %4750 = vmatprep.subr.bf16.mxu1 %v4942_v10 }
 0xb42   : > { %v2764_v7 = vpop.f32.mrb[60].mxu0  ;;  %v2970_v9 = vpop.f32.mrb[68].mxu1 }
 0xb43   : > { %v2765_v11 = vadd.f32 %v4203_v4, %v2764_v7  ;;  %v2971_v61 = vadd.f32 %v4238_v5, %v2970_v9  ;;  %v4676_v12 = vpop.f32.mrb[61].mxu0  ;;  %v4700_v13 = vpop.f32.mrb[69].mxu1 }
 0xb44   : > { %v2767_v14 = vpop.f32.mrb[62].mxu0  ;;  %v2973_v21 = vpop.f32.mrb[70].mxu1 }
 0xb45   : > { %v2875_v16 = vpack.c.bf16 %v2765_v11, %v2765_v11  ;;  %v3132_v17 = vpack.c.bf16 %v2971_v61, %v2971_v61  ;;  %v4677_v18 = vpop.f32.mrb[63].mxu0  ;;  %v4701_v19 = vpop.f32.mrb[71].mxu1 }
 0xb47   : > { %v3186_v22 = vsel %vm1499_vm2, %v2875_v16, 0  ;;  %v3380_v23 = vsel %vm1749_vm3, %v3132_v17, 0  ;;  %4741 = vmatmul.mubr.msk.bf16.vlgmr.msra.gmra.mrb[80].mxu1 %vm1499_vm2, %v2618_v15 }
 0xb48   : > { %4733 = vmatpush3.bf16.xpose.msra.mxu0 %v3186_v22  ;;  %4751 = vmatpush3.bf16.msra.mxu1 %v3380_v23 }
 0xb49   : > { %4744 = vmatprep.subr.bf16.mxu0 %v4942_v10  ;;  %4752 = vmatprep.mubr.msk.bf16.mxu1 %vm4943_vm1, %v4942_v10 }
 0xb4a   : > { %v2868_v26 = vpop.f32.mrb[64].mxu0  ;;  %v5619_v27 = vpop.f32.mrb[72].mxu1  ;;  %4762 = vmatprep.subr.bf16.mxu1 %v4942_v10 }
 0xb4b   : > { %v2869_v28 = vadd.f32 %v4205_v24, %v2868_v26  ;;  %v4692_v29 = vpop.f32.mrb[65].mxu0  ;;  %v4716_v30 = vpop.f32.mrb[73].mxu1 }
 0xb4c   : > { %v2871_v31 = vpop.f32.mrb[66].mxu0  ;;  %v3077_v32 = vpop.f32.mrb[74].mxu1 }
 0xb4d   : > { %v2877_v34 = vpack.c.bf16 %v2869_v28, %v2869_v28  ;;  %v4693_v35 = vpop.f32.mrb[67].mxu0  ;;  %v4717_v36 = vpop.f32.mrb[75].mxu1 }
 0xb4f   : > { %v3278_v38 = vsel %vm1499_vm2, %v2877_v34, 0  ;;  %4735 = vmatmul.mubr.msk.bf16.vlgmr.msra.gmra.mrb[76].mxu0 %vm1499_vm2, %v2617_v33 }
 0xb50   : > { %4745 = vmatpush3.bf16.xpose.msra.mxu0 %v3278_v38  ;;  %4746 = vmatprep.mubr.msk.bf16.mxu0 %vm4943_vm1, %v4942_v10 }
 0xb51   : > { %4756 = vmatprep.subr.bf16.mxu0 %v4942_v10 }
 0xb52   : > { %v3022_v42 = vpop.f32.mrb[68].mxu0 }
 0xb53   : > { %v3023_v43 = vadd.f32 %v4239_v40, %v3022_v42  ;;  %v4708_v44 = vpop.f32.mrb[69].mxu0  ;;  %v4240_v42 = vld [vmem:[%s5781_s9 + $0x6] ss:$0 sm:$0xff] }
 0xb54   : > { %v3025_v45 = vpop.f32.mrb[70].mxu0 }
 0xb55   : > { %v3133_v47 = vpack.c.bf16 %v3023_v43, %v3023_v43  ;;  %v4709_v48 = vpop.f32.mrb[71].mxu0  ;;  %v3075_v43 = vadd.f32 %v4240_v42, %v5619_v27 }
 0xb57   : > { %v3426_v49 = vsel %vm1749_vm3, %v3133_v47, 0  ;;  %4747 = vmatmul.mubr.msk.bf16.vlgmr.msra.gmra.mrb[80].mxu0 %vm1499_vm2, %v2619_v46  ;;  %v3134_v46 = vpack.c.bf16 %v3075_v43, %v3075_v43 }
 0xb58   : > { %4757 = vmatpush3.bf16.msra.mxu0 %v3426_v49  ;;  %4758 = vmatprep.mubr.msk.bf16.mxu0 %vm4943_vm1, %v4942_v10 }
 0xb59   : > { %4768 = vmatprep.subr.bf16.mxu0 %v4942_v10  ;;  %v3472_v49 = vsel %vm1749_vm3, %v3134_v46, 0 }
 0xb5a   : > { %v5638_v50 = vpop.f32.mrb[72].mxu0 }
 0xb5b   : > { %v4724_v51 = vpop.f32.mrb[73].mxu0 }
 0xb5c   : > { %v3129_v52 = vpop.f32.mrb[74].mxu0 }
 0xb5d   : > { %v4725_v53 = vpop.f32.mrb[75].mxu0 }
 0xb5e   : > { %v4241_v53 = vld [vmem:[%s5781_s9 + $0x7] ss:$0 sm:$0xff] }
 0xc12   : > { %v3176_v54 = vpop.f32.mrb[76].mxu1 }
 0xc13   : > { %v3320_v55 = vmul.f32 0.35355338, %v3176_v54  ;;  %v4730_v56 = vpop.f32.mrb[77].mxu1 }
 0xc14   : > { %v3179_v57 = vpop.f32.mrb[78].mxu1 }
 0xc15   : > { %v4731_v58 = vpop.f32.mrb[79].mxu1  ;;  %v3324_v59 = vadd.f32 %v5302_v1, %v3320_v55  ;;  %v3127_v55 = vadd.f32 %v4241_v53, %v5638_v50 }
 0xc17   : > { %v3328_v60 = vsel %vm1499_vm2, %v3324_v59, -inf  ;;  %v3135_v58 = vpack.c.bf16 %v3127_v55, %v3127_v55 }
 0xc18   : > { %3329 = vmax.xlane.f32.xlu0 %v3328_v60 }
 0xc1a   : > { %v3268_v62 = vpop.f32.mrb[80].mxu1 }
 0xc1b   : > { %v3322_v63 = vmul.f32 0.35355338, %v3268_v62  ;;  %v4742_v0 = vpop.f32.mrb[81].mxu1  ;;  %v3518_v62 = vsel %vm1749_vm3, %v3135_v58, 0 }
 0xc1c   : > { %v3271_v39 = vpop.f32.mrb[82].mxu1 }
 0xc1d   : > { %v4743_v2 = vpop.f32.mrb[83].mxu1  ;;  %v3326_v3 = vadd.f32 %v5302_v1, %v3322_v63  ;;  %v4262_v39 = vld [vmem:[%s5782_s10 + $0x10] sm:$0xf] }
 0xc1e   : > { %v3573_v2 = vsel %vm1749_vm3, %v4262_v39, 0 }
 0xc1f   : > { %v3334_v4 = vsel %vm1499_vm2, %v3326_v3, -inf }
 0xc20   : > { %3335 = vmax.xlane.f32.xlu0 %v3334_v4 }
 0xc22   : > { %v3222_v5 = vpop.f32.mrb[76].mxu0 }
 0xc23   : > { %v3321_v6 = vmul.f32 0.35355338, %v3222_v5  ;;  %v4736_v7 = vpop.f32.mrb[77].mxu0  ;;  %v4264_v5 = vld [vmem:[%s5782_s10 + $0x18] sm:$0xf] }
 0xc24   : > { %v3225_v9 = vpop.f32.mrb[78].mxu0 }
 0xc25   : > { %v4737_v11 = vpop.f32.mrb[79].mxu0  ;;  %v3325_v61 = vadd.f32 %v5302_v1, %v3321_v6 }
 0xc26   : > { %v3665_v11 = vsel %vm1749_vm3, %v4264_v5, 0 }
 0xc27   : > { %v3331_v12 = vsel %vm1499_vm2, %v3325_v61, -inf }
 0xc28   : > { %3332 = vmax.xlane.f32.xlu1 %v3331_v12 }
 0xc2a   : > { %v3314_v13 = vpop.f32.mrb[80].mxu0 }
 0xc2b   : > { %v3323_v14 = vmul.f32 0.35355338, %v3314_v13  ;;  %v4748_v21 = vpop.f32.mrb[81].mxu0 }
 0xc2c   : > { %v3317_v15 = vpop.f32.mrb[82].mxu0 }
 0xc2d   : > { %v4749_v16 = vpop.f32.mrb[83].mxu0  ;;  %v3327_v17 = vadd.f32 %v5302_v1, %v3323_v14 }
 0xc2f   : > { %v3337_v18 = vsel %vm1499_vm2, %v3327_v17, -inf }
 0xc30   : > { %3338 = vmax.xlane.f32.xlu1 %v3337_v18 }
 0xca5   : > { %v3330_v19 = vpop.xlane.xlu0 %3329 }
 0xca6   : > { %v3340_v20 = vsub.f32 %v3324_v59, %v3330_v19 }
 0xca8   : > { %v3344_v22 = vmul.f32 1.442695, %v3340_v20 }
 0xcaa   : > { %4912 = vpow2.f32 %v3344_v22 }
 0xcad   : > { %v3336_v23 = vpop.xlane.xlu0 %3335 }
 0xcae   : > { %v3342_v24 = vsub.f32 %v3326_v3, %v3336_v23  ;;  %v4263_v3 = vld [vmem:[%s5782_s10 + $0x14] sm:$0xf] }
 0xcaf   : > { %v3619_v4 = vsel %vm1749_vm3, %v4263_v3, 0 }
 0xcb0   : > { %v3348_v25 = vmul.f32 1.442695, %v3342_v24 }
 0xcb2   : > { %4914 = vpow2.f32 %v3348_v25 }
 0xcb4   : > { %v4913_v26 = vpop.eup %4912 }
 0xcb5   : > { %v3333_v28 = vpop.xlane.xlu1 %3332  ;;  %v3352_v29 = vsel %vm1499_vm2, %v4913_v26, 0.0 }
 0xcb6   : > { %v3341_v30 = vsub.f32 %v3325_v61, %v3333_v28  ;;  %3353 = vadd.xlane.f32.xlu0 %v3352_v29 }
 0xcb8   : > { %v3346_v31 = vmul.f32 1.442695, %v3341_v30 }
 0xcba   : > { %4916 = vpow2.f32 %v3346_v31 }
 0xcbc   : > { %v4915_v1 = vpop.eup %4914 }
 0xcbd   : > { %v3339_v32 = vpop.xlane.xlu1 %3338  ;;  %v3358_v33 = vsel %vm1499_vm2, %v4915_v1, 0.0 }
 0xcbe   : > { %v3343_v34 = vsub.f32 %v3327_v17, %v3339_v32  ;;  %3359 = vadd.xlane.f32.xlu0 %v3358_v33  ;;  %v4265_v17 = vld [vmem:[%s5782_s10 + $0x1c] sm:$0xf] }
 0xcbf   : > { %v3711_v22 = vsel %vm1749_vm3, %v4265_v17, 0 }
 0xcc0   : > { %v3350_v35 = vmul.f32 1.442695, %v3343_v34 }
 0xcc2   : > { %4918 = vpow2.f32 %v3350_v35 }
 0xcc4   : > { %v4917_v36 = vpop.eup %4916 }
 0xcc5   : > { %v3355_v37 = vsel %vm1499_vm2, %v4917_v36, 0.0 }
 0xcc6   : > { %3356 = vadd.xlane.f32.xlu1 %v3355_v37 }
 0xccc   : > { %v4919_v38 = vpop.eup %4918 }
 0xccd   : > { %v3361_v40 = vsel %vm1499_vm2, %v4919_v38, 0.0 }
 0xcce   : > { %3362 = vadd.xlane.f32.xlu1 %v3361_v40 }
 0xd43   : > { %v3354_v41 = vpop.xlane.xlu0 %3353 }
 0xd44   : > { %4920 = vrcp.f32 %v3354_v41 }
 0xd4b   : > { %v3360_v44 = vpop.xlane.xlu0 %3359 }
 0xd4c   : > { %4922 = vrcp.f32 %v3360_v44 }
 0xd4e   : > { %v4921_v45 = vpop.eup %4920 }
 0xd4f   : > { %v3368_v47 = vmul.f32 %v4921_v45, %v4913_v26 }
 0xd51   : > { %v3372_v48 = vpack.c.bf16 %v3368_v47, %v3368_v47 }
 0xd53   : > { %v3357_v51 = vpop.xlane.xlu1 %3356  ;;  %4753 = vmatmul.mubr.msk.bf16.vlgmr.msra.gmra.mrb[84].mxu1 %vm1499_vm2, %v3372_v48 }
 0xd54   : > { %4924 = vrcp.f32 %v3357_v51  ;;  %4763 = vmatpush3.bf16.msra.mxu1 %v3472_v49  ;;  %4764 = vmatprep.mubr.msk.bf16.mxu1 %vm4943_vm1, %v4942_v10  ;;  %v4271_v51 = vld [vmem:[%s5783_s11 + $0x1] ss:$0 sm:$0xff] }
 0xd55   : > { %4774 = vmatprep.subr.bf16.mxu1 %v4942_v10 }
 0xd56   : > { %v4923_v52 = vpop.eup %4922 }
 0xd57   : > { %v3370_v27 = vmul.f32 %v4923_v52, %v4915_v1 }
 0xd59   : > { %v3374_v54 = vpack.c.bf16 %v3370_v27, %v3370_v27 }
 0xd5b   : > { %v3363_v56 = vpop.xlane.xlu1 %3362  ;;  %4765 = vmatmul.mubr.msk.bf16.vlgmr.msra.gmra.mrb[88].mxu1 %vm1499_vm2, %v3374_v54 }
 0xd5c   : > { %4926 = vrcp.f32 %v3363_v56  ;;  %4776 = vmatprep.mubr.msk.bf16.mxu1 %vm4943_vm1, %v4942_v10  ;;  %4775 = vmatpush3.bf16.msra.mxu1 %v3573_v2 }
 0xd5d   : > { %4786 = vmatprep.subr.bf16.mxu1 %v4942_v10 }
 0xd5e   : > { %v4925_v57 = vpop.eup %4924 }
 0xd5f   : > { %v3369_v59 = vmul.f32 %v4925_v57, %v4917_v36 }
 0xd61   : > { %v3373_v60 = vpack.c.bf16 %v3369_v59, %v3369_v59 }
 0xd63   : > { %4759 = vmatmul.mubr.msk.bf16.vlgmr.msra.gmra.mrb[84].mxu0 %vm1499_vm2, %v3373_v60 }
 0xd64   : > { %4769 = vmatpush3.bf16.msra.mxu0 %v3518_v62  ;;  %4770 = vmatprep.mubr.msk.bf16.mxu0 %vm4943_vm1, %v4942_v10 }
 0xd65   : > { %4780 = vmatprep.subr.bf16.mxu0 %v4942_v10 }
 0xd66   : > { %v4927_v50 = vpop.eup %4926 }
 0xd67   : > { %v3371_v63 = vmul.f32 %v4927_v50, %v4919_v38 }
 0xd69   : > { %v3375_v0 = vpack.c.bf16 %v3371_v63, %v3371_v63  ;;  %v4882_v63 = vld [vmem:[%s5786_s14 + $0x10] sm:$0xff]  }
 0xd6b   : > { %4771 = vmatmul.mubr.msk.bf16.vlgmr.msra.gmra.mrb[88].mxu0 %vm1499_vm2, %v3375_v0  ;;  %v4883_v0 = vld [vmem:[%s5786_s14 + $0x18] sm:$0xff]  }
 0xd6c   : > { %4782 = vmatprep.mubr.msk.bf16.mxu0 %vm4943_vm1, %v4942_v10  ;;  %4781 = vmatpush3.bf16.msra.mxu0 %v3619_v4  ;;  %v4274_v4 = vld [vmem:[%s5784_s12 + $0x1] ss:$0 sm:$0xff] }
 0xd6d   : > { %4792 = vmatprep.subr.bf16.mxu0 %v4942_v10 }
 0xe26   : > { %v3416_v6 = vpop.f32.mrb[84].mxu1 }
 0xe27   : > { %v3560_v7 = vpack.c.bf16 %v3416_v6, %v3416_v6  ;;  %v4754_v9 = vpop.f32.mrb[85].mxu1  ;;  %v4275_v6 = vld [vmem:[%s5785_s13 + $0x1] ss:$0 sm:$0xff] }
 0xe28   : > { %v3419_v61 = vpop.f32.mrb[86].mxu1 }
 0xe29   : > { %v4755_v12 = vpop.f32.mrb[87].mxu1  ;;  %4777 = vmatmul.mubr.msk.bf16.vlgmr.msra.gmra.mrb[92].mxu1 %vm1499_vm2, %v3560_v7  ;;  %v4884_v61 = vld [vmem:[%s5788_s16 + $0x20] sm:$0xff]  }
 0xe2a   : > { %4787 = vmatpush3.bf16.msra.mxu1 %v3665_v11  ;;  %4788 = vmatprep.mubr.msk.bf16.mxu1 %vm4943_vm1, %v4942_v10  ;;  %v4885_v12 = vld [vmem:[%s5788_s16 + $0x28] sm:$0xff]  }
 0xe2b   : > { %4798 = vmatprep.subr.bf16.mxu1 %v4942_v10 }
 0xe2e   : > { %v3508_v13 = vpop.f32.mrb[88].mxu1 }
 0xe2f   : > { %v3562_v14 = vpack.c.bf16 %v3508_v13, %v3508_v13  ;;  %v4766_v21 = vpop.f32.mrb[89].mxu1  ;;  %v4886_v13 = vld [vmem:[%s5788_s16 + $0x30] sm:$0xff]  }
 0xe30   : > { %v3511_v15 = vpop.f32.mrb[90].mxu1  ;;  %v4281_v21 = vld [vmem:[%s5787_s15 + $0x1] ss:$0 sm:$0xff] }
 0xe31   : > { %v4767_v16 = vpop.f32.mrb[91].mxu1  ;;  %4789 = vmatmul.mubr.msk.bf16.vlgmr.msra.gmra.mrb[96].mxu1 %vm1499_vm2, %v3562_v14  ;;  %v4887_v14 = vld [vmem:[%s5788_s16 + $0x38] sm:$0xff]  }
 0xe32   : > { %4802 = vmatprep.mubr.msk.bf16.mxu1 %vm4943_vm1, %v4942_v10  ;;  %4799 = vmatpush3.bf16.msra.mxu1 %v4882_v63 }
 0xe33   : > { %4800 = vmatprep.subr.bf16.mxu1 %v4942_v10 }
 0xe36   : > { %v3462_v18 = vpop.f32.mrb[84].mxu0  ;;  %4801 = vmatpush3.bf16.msra.mxu1 %v4883_v0 }
 0xe37   : > { %v3561_v19 = vpack.c.bf16 %v3462_v18, %v3462_v18  ;;  %v4760_v20 = vpop.f32.mrb[85].mxu0 }
 0xe38   : > { %v3465_v23 = vpop.f32.mrb[86].mxu0 }
 0xe39   : > { %v4761_v24 = vpop.f32.mrb[87].mxu0  ;;  %4783 = vmatmul.mubr.msk.bf16.vlgmr.msra.gmra.mrb[92].mxu0 %vm1499_vm2, %v3561_v19 }
 0xe3a   : > { %4793 = vmatpush3.bf16.msra.mxu0 %v3711_v22  ;;  %4794 = vmatprep.mubr.msk.bf16.mxu0 %vm4943_vm1, %v4942_v10 }
 0xe3b   : > { %4806 = vmatprep.subr.bf16.mxu0 %v4942_v10 }
 0xe3e   : > { %v3554_v25 = vpop.f32.mrb[88].mxu0 }
 0xe3f   : > { %v3563_v26 = vpack.c.bf16 %v3554_v25, %v3554_v25  ;;  %v4772_v28 = vpop.f32.mrb[89].mxu0 }
 0xe40   : > { %v3557_v29 = vpop.f32.mrb[90].mxu0 }
 0xe41   : > { %v4773_v30 = vpop.f32.mrb[91].mxu0  ;;  %4795 = vmatmul.mubr.msk.bf16.vlgmr.msra.gmra.mrb[96].mxu0 %vm1499_vm2, %v3563_v26 }
 0xe42   : > { %4814 = vmatprep.mubr.msk.bf16.mxu0 %vm4943_vm1, %v4942_v10  ;;  %4807 = vmatpush3.bf16.msra.mxu0 %v4884_v61 }
 0xe43   : > { %4808 = vmatprep.subr.bf16.mxu0 %v4942_v10 }
 0xe46   : > { %4809 = vmatpush3.bf16.msra.mxu0 %v4885_v12 }
 0xe47   : > { %4810 = vmatprep.subr.bf16.mxu0 %v4942_v10 }
 0xe4a   : > { %4811 = vmatpush3.bf16.msra.mxu0 %v4886_v13 }
 0xe4b   : > { %4812 = vmatprep.subr.bf16.mxu0 %v4942_v10 }
 0xe4e   : > { %4813 = vmatpush3.bf16.msra.mxu0 %v4887_v14 }
 0xefc   : > { %v3609_v31 = vpop.f32.mrb[92].mxu1 }
 0xefd   : > { %v4778_v1 = vpop.f32.mrb[93].mxu1  ;;  %v3753_v40 = vsel %vm697_vm0, %v3609_v31, 0.0  ;;  %v4294_v31 = vld [vmem:[%s5789_s17 + $0x1] ss:$0 sm:$0xff] }
 0xefe   : > { %v3612_v32 = vpop.f32.mrb[94].mxu1 }
 0xeff   : > { %v4779_v33 = vpop.f32.mrb[95].mxu1 }
 0xf04   : > { %v3701_v34 = vpop.f32.mrb[96].mxu1 }
 0xf05   : > { %v4790_v35 = vpop.f32.mrb[97].mxu1  ;;  %v3756_v45 = vsel %vm697_vm0, %v3701_v34, 0.0 }
 0xf06   : > { %v3704_v36 = vpop.f32.mrb[98].mxu1 }
 0xf07   : > { %v4791_v37 = vpop.f32.mrb[99].mxu1 }
 0xf0c   : > { %v3655_v38 = vpop.f32.mrb[92].mxu0 }
 0xf0d   : > { %v3754_v41 = vsel %vm697_vm0, %v3655_v38, 0.0  ;;  %v4784_v42 = vpop.f32.mrb[93].mxu0 }
 0xf0e   : > { %v3755_v43 = vadd.f32 %v3754_v41, %v3753_v40  ;;  %v3658_v44 = vpop.f32.mrb[94].mxu0 }
 0xf0f   : > { %v4785_v46 = vpop.f32.mrb[95].mxu0 }
 0xf10   : > { %v3757_v47 = vadd.f32 %v3756_v45, %v3755_v43 }
 0xf14   : > { %v3747_v48 = vpop.f32.mrb[96].mxu0 }
 0xf15   : > { %v3758_v49 = vsel %vm697_vm0, %v3747_v48, 0.0  ;;  %v4796_v52 = vpop.f32.mrb[97].mxu0  ;;  %v4302_v48 = vld [vmem:[%s5790_s18 + $0x1] ss:$0 sm:$0xff] }
 0xf16   : > { %v3759_v27 = vadd.f32 %v3758_v49, %v3757_v47  ;;  %v3750_v53 = vpop.f32.mrb[98].mxu0 }
 0xf17   : > { %v4797_v54 = vpop.f32.mrb[99].mxu0 }
 0xf18   : > { %v3768_v55 = vadd.f32 %v4271_v51, %v3759_v27  ;;  %v4303_v51 = vld [vmem:[%s5791_s19 + $0x1] ss:$0 sm:$0xff]  ;;  %v3996_v27 = vld [vmem:[%s5792_s20] sm:$0x1] }
 0xf1a   : > { %v3769_v56 = vadd.f32 %v3768_v55, %v5448_v8 }
 0xf1c   : > { %v3774_v57 = vsel %vm697_vm0, %v3769_v56, 0.0 }
 0xf1d   : > { %3775 = vadd.xlane.f32.xlu0 %v3774_v57 }
 0xfaa   : > { %v3776_v58 = vpop.xlane.xlu0 %3775 }
 0xfab   : > { %v3777_v59 = vmul.f32 0.03125, %v3776_v58 }
 0xfad   : > { %v3778_v60 = vsub.f32 %v3769_v56, %v3777_v59  ;;  %v4002_v56 = vld [vmem:[#allocation2] sm:$0x1] }
 0xfaf   : > { %v3779_v62 = vmul.f32 %v3778_v60, %v3778_v60 }
 0xfb1   : > { %v3780_v50 = vsel %vm697_vm0, %v3779_v62, 0.0 }
 0xfb2   : > { %3781 = vadd.xlane.f32.xlu1 %v3780_v50 }
0x103f   : > { %v3782_v8 = vpop.xlane.xlu1 %3781 }
0x1040   : > { %v3783_v39 = vmul.f32 0.03125, %v3782_v8 }
0x1042   : > { %v3784_v2 = vadd.f32 1e-12, %v3783_v39 }
0x1044   : > { %4928 = vrsqrt.f32 %v3784_v2 }
0x104e   : > { %v4929_v3 = vpop.eup %4928 }
0x104f   : > { %v3786_v5 = vmul.f32 %v4929_v3, %v3778_v60 }
0x1051   : > { %v3793_v7 = vmul.f32 %v4274_v4, %v3786_v5 }
0x1053   : > { %v3800_v9 = vadd.f32 %v4275_v6, %v3793_v7 }
0x1055   : > { %v3801_v11 = vpack.c.bf16 %v3800_v9, %v3800_v9 }
0x1057   : > { %4803 = vmatmul.mubr.msk.bf16.vlgmr.msra.gmra.mrb[100].mxu1 %vm697_vm0, %v3801_v11 }
0x112a   : > { %v3864_v15 = vpop.f32.mrb[100].mxu1 }
0x112b   : > { %v3865_v16 = vadd.f32 %v4281_v21, %v3864_v15  ;;  %v4804_v17 = vpop.f32.mrb[101].mxu1 }
0x112c   : > { %v3867_v18 = vpop.f32.mrb[102].mxu1 }
0x112d   : > { %v3871_v19 = vmul.f32 0.044715, %v3865_v16  ;;  %v4805_v20 = vpop.f32.mrb[103].mxu1  ;;  %v3870_v28 = vmul.f32 0.5, %v3865_v16 }
0x112f   : > { %v3872_v22 = vmul.f32 %v3871_v19, %v3865_v16 }
0x1131   : > { %v3873_v23 = vmul.f32 %v3872_v22, %v3865_v16 }
0x1133   : > { %v3874_v24 = vadd.f32 %v3873_v23, %v3865_v16 }
0x1135   : > { %v3875_v25 = vmul.f32 0.7978846, %v3874_v24 }
0x1137   : > { %4930 = vtanh.f32 %v3875_v25 }
0x1141   : > { %v4931_v26 = vpop.eup %4930 }
0x1142   : > { %v3877_v29 = vadd.f32 1.0, %v4931_v26 }
0x1144   : > { %v3878_v10 = vmul.f32 %v3877_v29, %v3870_v28 }
0x1146   : > { %v3879_v30 = vpack.c.bf16 %v3878_v10, %v3878_v10 }
0x1148   : > { %4815 = vmatmul.mubr.msk.bf16.vlgmr.msra.gmra.mrb[100].mxu0 %vm2284_vm4, %v3879_v30 }
0x121b   : > { %v3958_v1 = vpop.f32.mrb[100].mxu0 }
0x121c   : > { %v3959_v32 = vadd.f32 %v4294_v31, %v3958_v1  ;;  %v4816_v33 = vpop.f32.mrb[101].mxu0 }
0x121d   : > { %v3961_v34 = vpop.f32.mrb[102].mxu0 }
0x121e   : > { %v4817_v35 = vpop.f32.mrb[103].mxu0  ;;  %v3964_v36 = vadd.f32 %v3959_v32, %v3800_v9 }
0x1220   : > { %v3969_v37 = vsel %vm697_vm0, %v3964_v36, 0.0 }
0x1221   : > { %3970 = vadd.xlane.f32.xlu0 %v3969_v37 }
0x12ae   : > { %v3971_v38 = vpop.xlane.xlu0 %3970 }
0x12af   : > { %v3972_v40 = vmul.f32 0.03125, %v3971_v38 }
0x12b1   : > { %v3973_v41 = vsub.f32 %v3964_v36, %v3972_v40 }
0x12b3   : > { %v3974_v42 = vmul.f32 %v3973_v41, %v3973_v41 }
0x12b5   : > { %v3975_v43 = vsel %vm697_vm0, %v3974_v42, 0.0 }
0x12b6   : > { %3976 = vadd.xlane.f32.xlu1 %v3975_v43 }
0x1343   : > { %v3977_v44 = vpop.xlane.xlu1 %3976 }
0x1344   : > { %v3978_v45 = vmul.f32 0.03125, %v3977_v44 }
0x1346   : > { %v3979_v46 = vadd.f32 1e-12, %v3978_v45 }
0x1348   : > { %4932 = vrsqrt.f32 %v3979_v46 }
0x1352   : > { %v4933_v47 = vpop.eup %4932 }
0x1353   : > { %v3981_v49 = vmul.f32 %v4933_v47, %v3973_v41 }
0x1355   : > { %v3988_v52 = vmul.f32 %v4302_v48, %v3981_v49 }
0x1357   : > { %v3995_v53 = vadd.f32 %v4303_v51, %v3988_v52 }
0x1359   : > { %v3997_v54 = vmul.f32 %v3996_v27, %v3995_v53 }
0x135b   : > { %v3999_v55 = vsel %vm3998_vm5, %v3997_v54, 0.0 }
0x135c   : > { %4000 = vadd.xlane.f32.xlu0 %v3999_v55 }
0x13e9   : > { %v4001_v57 = vpop.xlane.xlu0 %4000 }
0x13ea   : > { %v4003_v58 = vadd.f32 %v4002_v56, %v4001_v57 }
0x13ec   : > { %4005 = vst.msk [vmem:[%s692_s24] sm:$0x1] %vm4004_vm6, %v4003_v58 }
0x13ed PF: > { %s34_s29 = sadd.s32 1, %s4940_s29  }
0x13ee   : > { %p31_p4 = scmp.ge.s32.totalorder %s34_s29, 4  }
0x13f0   :  { %33 = sbr.rel (!%p31_p4) target bundleno = 8 (0x8), region = 157 }

</bundles_post_ra>
